<compile_context>
chip_gen: v5e
topology: v5e:2x2
jax: 0.10.0
libtpu: 0.0.40
codegen_flags: <defaults>
</compile_context>

<pallas_src>
import functools

import jax
import jax.numpy as jnp
from jax.experimental import pallas as pl
from jax.experimental.pallas import tpu as pltpu

EPS = 1e-5
LRELU_SLOPE = 0.2
LANE = 128
SUBLANE_BF16 = 16


def _round_up(x, m):
    return (x + m - 1) // m * m


def _vmem_capacity_bytes():
    try:
        cap = getattr(pltpu.get_tpu_info(), "vmem_capacity_bytes", None)
        if cap:
            return int(cap)
    except Exception:
        pass
    return 64 << 20  # conservative fallback (safe on every generation)


def _vmem_limit_bytes():
    return max(32 << 20, int(_vmem_capacity_bytes() * 0.85))


def _choose_tile_m(M, Kp, Cp, out_bytes, max_tile_m=None):
    """Largest bf16-sublane-aligned M-tile fitting ~60% of the VMEM budget."""
    budget = int(_vmem_limit_bytes() * 0.6)
    fixed = 2 * (Kp * Cp * 2)                        # double-buffered bf16 weights
    per_row = 2 * (Kp * 2) + 2 * (Cp * out_bytes)    # dbl-buffered patches + output
    tile = (budget - fixed) // per_row
    tile = max(SUBLANE_BF16, min(tile, 2048))
    tile = (tile // SUBLANE_BF16) * SUBLANE_BF16
    if max_tile_m is not None:
        tile = min(tile, _round_up(max_tile_m, SUBLANE_BF16))
    tile = min(tile, _round_up(M, SUBLANE_BF16))
    return max(tile, SUBLANE_BF16)


# --------------------------------------------------------------------------
# Kernels
# --------------------------------------------------------------------------
def _post_act(y, kind):
    if kind == "lrelu":
        return jnp.where(y >= 0.0, y, LRELU_SLOPE * y)
    if kind == "sigmoid":
        return 1.0 / (1.0 + jnp.exp(-y))   # exact reciprocal for torch parity
    return y


def _conv_bias_act_kernel(p_ref, w_ref, b_ref, o_ref, *, post):
    """Non-BN ConvBlock tile: bf16 MXU matmul + bias + optional activation."""
    y = jnp.dot(p_ref[...], w_ref[...], preferred_element_type=jnp.float32)
    y = y + b_ref[...]
    o_ref[...] = _post_act(y, post).astype(o_ref.dtype)


def _conv_bn_fused_kernel(p_ref, w_ref, g_ref, beta_ref, o_ref, *, post, m_real):
    """Whole-M-in-one-tile BN ConvBlock: matmul + train-mode BN + activation."""
    y = jnp.dot(p_ref[...], w_ref[...], preferred_element_type=jnp.float32)
    inv_m = 1.0 / float(m_real)
    mean = jnp.sum(y, axis=0, keepdims=True) * inv_m        # padded rows are 0
    var = jnp.sum(y * y, axis=0, keepdims=True) * inv_m - mean * mean
    scale = g_ref[...] * jax.lax.rsqrt(var + EPS)
    y = (y - mean) * scale + beta_ref[...]
    o_ref[...] = _post_act(y, post).astype(o_ref.dtype)


def _conv_stats_kernel(p_ref, w_ref, y_ref, stats_ref):
    """BN pass 1: matmul once, write un-normalized y + per-tile sum / sum-sq."""
    y = jnp.dot(p_ref[...], w_ref[...], preferred_element_type=jnp.float32)
    y_ref[...] = y
    s = jnp.sum(y, axis=0, keepdims=True)          # zero-padded rows contribute 0
    q = jnp.sum(y * y, axis=0, keepdims=True)
    rows = jax.lax.broadcasted_iota(jnp.int32, (8, y.shape[1]), 0)
    stats = jnp.where(rows == 0, s, jnp.where(rows == 1, q, 0.0))
    stats_ref[...] = stats[None]


def _bn_apply_kernel(y_ref, scale_ref, shift_ref, o_ref, *, post):
    """BN pass 2: cheap readback of y, per-channel scale/shift, activation."""
    y = y_ref[...] * scale_ref[...] + shift_ref[...]
    o_ref[...] = _post_act(y, post).astype(o_ref.dtype)


# --------------------------------------------------------------------------
# Wrappers
# --------------------------------------------------------------------------
def im2col(x, kh, kw, stride, pad):
    """x: [B,H,W,C] -> patches [B*Ho*Wo, kh*kw*C] (row order matches HWIO weights)."""
    B, H, W, C = x.shape
    xp = jnp.pad(x, ((0, 0), (pad, pad), (pad, pad), (0, 0)))
    Ho = (H + 2 * pad - kh) // stride + 1
    Wo = (W + 2 * pad - kw) // stride + 1
    cols = []
    for i in range(kh):
        for j in range(kw):
            cols.append(xp[:, i:i + stride * Ho:stride, j:j + stride * Wo:stride, :])
    patches = jnp.stack(cols, axis=3)                      # [B, Ho, Wo, kh*kw, C]
    return patches.reshape(B * Ho * Wo, kh * kw * C), Ho, Wo


def conv_block(x, params, *, stride, batch_norm, post=None,
               out_dtype=jnp.bfloat16, max_tile_m=None):
    """One ConvBlock: 4x4 conv (pad=1) [+ BatchNorm] [+ post activation].

    The LeakyReLU that torch applies to the NEXT conv's input is fused here as
    post="lrelu" on this layer's output (never on the 16x-replicated patches).
    """
    # TODO(synk): fuse im2col into the pallas_call via windowed BlockSpecs to
    # avoid the kh*kw-fold HBM duplication of the input at non-toy sizes.
    w, b, gamma, beta = params                              # w: [kh, kw, Cin, Cout]
    kh, kw, _, cout = w.shape
    B = x.shape[0]

    patches, Ho, Wo = im2col(x.astype(jnp.bfloat16), kh, kw, stride, pad=1)
    M, K = patches.shape
    Kp = _round_up(K, LANE)                 # lane-aligned contraction dim
    Cp = _round_up(cout, LANE)              # lane-dense output channels

    out_bytes = 4 if batch_norm else jnp.dtype(out_dtype).itemsize
    tile_m = _choose_tile_m(M, Kp, Cp, out_bytes, max_tile_m)
    Mp = _round_up(M, tile_m)
    J = Mp // tile_m

    patches = jnp.pad(patches, ((0, Mp - M), (0, Kp - K)))
    w_mat = jnp.pad(w.reshape(K, cout).astype(jnp.bfloat16),
                    ((0, Kp - K), (0, Cp - cout)))
    vmem_limit = _vmem_limit_bytes()

    patch_spec = pl.BlockSpec((tile_m, Kp), lambda j: (j, 0))
    w_spec = pl.BlockSpec((Kp, Cp), lambda j: (0, 0))
    vec_spec = pl.BlockSpec((1, Cp), lambda j: (0, 0))
    out_spec = pl.BlockSpec((tile_m, Cp), lambda j: (j, 0))
    par_params = pltpu.CompilerParams(dimension_semantics=("parallel",),
                                      vmem_limit_bytes=vmem_limit)

    if not batch_norm:
        b_p = jnp.pad(b, (0, Cp - cout)).reshape(1, Cp).astype(jnp.float32)
        out = pl.pallas_call(
            functools.partial(_conv_bias_act_kernel, post=post),
            out_shape=jax.ShapeDtypeStruct((Mp, Cp), out_dtype),
            grid=(J,),
            in_specs=[patch_spec, w_spec, vec_spec],
            out_specs=out_spec,
            compiler_params=par_params,
        )(patches, w_mat, b_p)
        return out[:M, :cout].reshape(B, Ho, Wo, cout)

    # BatchNorm layers: conv bias cancels exactly in (y - mean) -> dropped.
    g_p = jnp.pad(gamma, (0, Cp - cout)).reshape(1, Cp).astype(jnp.float32)
    be_p = jnp.pad(beta, (0, Cp - cout)).reshape(1, Cp).astype(jnp.float32)

    if J == 1:
        # Whole M fits one tile: matmul + stats + normalize in a single pass.
        out = pl.pallas_call(
            functools.partial(_conv_bn_fused_kernel, post=post, m_real=M),
            out_shape=jax.ShapeDtypeStruct((Mp, Cp), out_dtype),
            grid=(1,),
            in_specs=[patch_spec, w_spec, vec_spec, vec_spec],
            out_specs=out_spec,
            compiler_params=pltpu.CompilerParams(
                dimension_semantics=("arbitrary",),
                vmem_limit_bytes=vmem_limit),
        )(patches, w_mat, g_p, be_p)
        return out[:M, :cout].reshape(B, Ho, Wo, cout)

    # Multi-tile BN: two carried-state-free "parallel" passes (no matmul redo).
    y_spec = pl.BlockSpec((tile_m, Cp), lambda j: (j, 0))
    stats_spec = pl.BlockSpec((1, 8, Cp), lambda j: (j, 0, 0))
    y_full, stats = pl.pallas_call(
        _conv_stats_kernel,
        out_shape=(jax.ShapeDtypeStruct((Mp, Cp), jnp.float32),
                   jax.ShapeDtypeStruct((J, 8, Cp), jnp.float32)),
        grid=(J,),
        in_specs=[patch_spec, w_spec],
        out_specs=(y_spec, stats_spec),
        compiler_params=par_params,
    )(patches, w_mat)

    # Tiny per-channel reduction + scale/shift prep in XLA (Cp-sized).
    mean = stats[:, 0, :].sum(axis=0) / M
    var = stats[:, 1, :].sum(axis=0) / M - mean * mean      # biased (torch train BN)
    scale = (g_p[0] * jax.lax.rsqrt(var + EPS)).reshape(1, Cp)
    shift = (be_p[0] - mean * scale[0]).reshape(1, Cp)

    out = pl.pallas_call(
        functools.partial(_bn_apply_kernel, post=post),
        out_shape=jax.ShapeDtypeStruct((Mp, Cp), out_dtype),
        grid=(J,),
        in_specs=[y_spec, vec_spec, vec_spec],
        out_specs=out_spec,
        compiler_params=par_params,
    )(y_full, scale, shift)
    return out[:M, :cout].reshape(B, Ho, Wo, cout)


def init_params(key, input_dim, num_filter, output_dim):
    # Conv weights ~ N(0, 0.02) (matches normal_weight_init), BN gamma=1, beta=0.
    specs = [
        (input_dim, num_filter),
        (num_filter, num_filter * 2),
        (num_filter * 2, num_filter * 4),
        (num_filter * 4, num_filter * 8),
        (num_filter * 8, output_dim),
    ]
    params = []
    for cin, cout in specs:
        key, kw_, kb_ = jax.random.split(key, 3)
        w = 0.02 * jax.random.normal(kw_, (4, 4, cin, cout), jnp.float32)
        b = 0.02 * jax.random.normal(kb_, (cout,), jnp.float32)
        gamma = jnp.ones((cout,), jnp.float32)
        beta = jnp.zeros((cout,), jnp.float32)
        params.append((w, b, gamma, beta))
    return params


def discriminator_forward(x, label, params, *, max_tile_m=None):
    # x, label: NHWC
    h = jnp.concatenate([x, label], axis=-1)          # == torch.cat(dim=1) in NCHW
    # The LeakyReLU of each torch ConvBlock (applied to its INPUT) is fused
    # into the producing layer's store (post="lrelu") -> computed once per
    # activation instead of 16x on im2col patches.
    h = conv_block(h, params[0], stride=2, batch_norm=False, post="lrelu",
                   max_tile_m=max_tile_m)                                   # conv1
    h = conv_block(h, params[1], stride=2, batch_norm=True, post="lrelu",
                   max_tile_m=max_tile_m)                                   # conv2
    h = conv_block(h, params[2], stride=2, batch_norm=True, post="lrelu",
                   max_tile_m=max_tile_m)                                   # conv3
    h = conv_block(h, params[3], stride=1, batch_norm=True, post="lrelu",
                   max_tile_m=max_tile_m)                                   # conv4
    # TODO(synk): fuse the tiny conv4+conv5 tail into a single pallas_call to
    # remove the intermediate HBM round-trip / per-call overhead at toy sizes.
    h = conv_block(h, params[4], stride=1, batch_norm=False, post="sigmoid",
                   out_dtype=jnp.float32, max_tile_m=max_tile_m)            # conv5
    return h                                           # NHWC, f32, sigmoid range


def _leaky_relu(x):
    return jnp.where(x >= 0.0, x, LRELU_SLOPE * x)


def discriminator_reference(x, label, params):
    """Pure-JAX f32 reference of the torch forward (validation only)."""
    def conv(h, w, b, stride):
        out = jax.lax.conv_general_dilated(
            h, w, window_strides=(stride, stride), padding=((1, 1), (1, 1)),
            dimension_numbers=("NHWC", "HWIO", "NHWC"))
        return out + b

    def bn(h, gamma, beta):
        mean = jnp.mean(h, axis=(0, 1, 2), keepdims=True)
        var = jnp.mean(jnp.square(h - mean), axis=(0, 1, 2), keepdims=True)
        return gamma * (h - mean) * jax.lax.rsqrt(var + EPS) + beta

    h = jnp.concatenate([x, label], axis=-1)
    w, b, g, be = params[0]; h = conv(h, w, b, 2)
    w, b, g, be = params[1]; h = bn(conv(_leaky_relu(h), w, b, 2), g, be)
    w, b, g, be = params[2]; h = bn(conv(_leaky_relu(h), w, b, 2), g, be)
    w, b, g, be = params[3]; h = bn(conv(_leaky_relu(h), w, b, 1), g, be)
    w, b, g, be = params[4]; h = conv(_leaky_relu(h), w, b, 1)
    return jax.nn.sigmoid(h)


if __name__ == "__main__":
    # Small config: input_dim = Cx + Clabel = 2 + 2 = 4, num_filter = 4, output_dim = 1
    B, H, W = 2, 32, 32
    Cx, Clabel = 2, 2
    input_dim, num_filter, output_dim = Cx + Clabel, 4, 1

    key = jax.random.PRNGKey(0)
    kx, kl, kp = jax.random.split(key, 3)
    x = jax.random.normal(kx, (B, H, W, Cx), jnp.float32)          # NHWC
    label = jax.random.normal(kl, (B, H, W, Clabel), jnp.float32)  # NHWC
    params = init_params(kp, input_dim, num_filter, output_dim)

    fwd = jax.jit(discriminator_forward)
    out = jax.block_until_ready(fwd(x, label, params))

    # Expected spatial trace: 32 ->16 ->8 ->4 ->3 ->2  => out shape (B, 2, 2, 1)
    assert out.shape == (B, 2, 2, output_dim), out.shape
    assert bool(jnp.all(jnp.isfinite(out)))
    assert bool(jnp.all((out >= 0.0) & (out <= 1.0)))

    # Loose parity check vs. pure-JAX f32 reference (bf16 intermediates in kernel).
    ref = discriminator_reference(x, label, params)
    max_err = float(jnp.max(jnp.abs(out - ref)))
    assert max_err < 5e-2, max_err

    # Force the multi-tile (two-pass BatchNorm) path and multi-tile non-BN path;
    # it must agree with the fused single-tile run.
    fwd_small = jax.jit(functools.partial(discriminator_forward, max_tile_m=32))
    out_small = jax.block_until_ready(fwd_small(x, label, params))
    tiling_err = float(jnp.max(jnp.abs(out_small - out)))
    assert tiling_err < 2e-2, tiling_err

    print("KERNEL_OK")
</pallas_src>

<mosaic_0001>
module attributes {stable_mosaic.version = 11 : i64} {
  func.func @_conv_bias_act_kernel(%arg0: i32, %arg1: memref<512x128xbf16, #tpu.memory_space<vmem>>, %arg2: memref<128x128xbf16, #tpu.memory_space<vmem>>, %arg3: memref<1x128xf32, #tpu.memory_space<vmem>>, %arg4: memref<512x128xbf16, #tpu.memory_space<vmem>>) attributes {dimension_semantics = [#tpu.dimension_semantics<parallel>], iteration_bounds = array<i64: 1>, scalar_prefetch = 0 : i64, scratch_operands = 0 : i64, tpu.core_type = #tpu.core_type<tc>, window_params = [{transform_indices = @transform_0, window_bounds = array<i64: 512, 128>}, {pipeline_mode = #tpu.pipeline_mode<synchronous>, transform_indices = @transform_1, window_bounds = array<i64: 128, 128>}, {pipeline_mode = #tpu.pipeline_mode<synchronous>, transform_indices = @transform_2, window_bounds = array<i64: 1, 128>}, {transform_indices = @transform_3, window_bounds = array<i64: 512, 128>}]} {
    %c0 = arith.constant 0 : index
    %c0_0 = arith.constant 0 : index
    %0 = vector.load %arg1[%c0, %c0_0] : memref<512x128xbf16, #tpu.memory_space<vmem>>, vector<512x128xbf16>
    %c0_1 = arith.constant 0 : index
    %c0_2 = arith.constant 0 : index
    %1 = vector.load %arg2[%c0_1, %c0_2] : memref<128x128xbf16, #tpu.memory_space<vmem>>, vector<128x128xbf16>
    %cst = arith.constant dense<0.000000e+00> : vector<512x128xf32>
    %2 = tpu.matmul %0, %1, %cst {dimension_numbers = #tpu.dot_dimension_numbers<[1], [0], [0], [1], [0, 0, 1, 1], [], []>} : vector<512x128xbf16>, vector<128x128xbf16>, vector<512x128xf32> -> vector<512x128xf32>
    %c0_3 = arith.constant 0 : index
    %c0_4 = arith.constant 0 : index
    %3 = vector.load %arg3[%c0_3, %c0_4] : memref<1x128xf32, #tpu.memory_space<vmem>>, vector<1x128xf32>
    %4 = vector.broadcast %3 : vector<1x128xf32> to vector<512x128xf32>
    %5 = arith.addf %2, %4 : vector<512x128xf32>
    %cst_5 = arith.constant 0.000000e+00 : f32
    %6 = vector.broadcast %cst_5 : f32 to vector<512x128xf32>
    %7 = arith.cmpf oge, %5, %6 : vector<512x128xf32>
    %cst_6 = arith.constant 2.000000e-01 : f32
    %8 = vector.broadcast %cst_6 : f32 to vector<512x128xf32>
    %9 = arith.mulf %8, %5 : vector<512x128xf32>
    %10 = arith.select %7, %5, %9 : vector<512x128xi1>, vector<512x128xf32>
    %11 = arith.truncf %10 : vector<512x128xf32> to vector<512x128xbf16>
    %c0_7 = arith.constant 0 : index
    %c0_8 = arith.constant 0 : index
    %12 = vector.load %arg4[%c0_7, %c0_8] : memref<512x128xbf16, #tpu.memory_space<vmem>>, vector<512x128xbf16>
    tpu.vector_store %arg4[%c0_7, %c0_8], %11 {strides = array<i32>} : memref<512x128xbf16, #tpu.memory_space<vmem>>, vector<512x128xbf16>,
    return
  }
  func.func @transform_0(%arg0: i32) -> (i32, i32) {
    %c0_i32 = arith.constant 0 : i32
    %c0_i32_0 = arith.constant 0 : i32
    return %arg0, %c0_i32 : i32, i32
  }
  func.func @transform_1(%arg0: i32) -> (i32, i32) {
    %c0_i32 = arith.constant 0 : i32
    %c0_i32_0 = arith.constant 0 : i32
    %c0_i32_1 = arith.constant 0 : i32
    return %c0_i32, %c0_i32_0 : i32, i32
  }
  func.func @transform_2(%arg0: i32) -> (i32, i32) {
    %c0_i32 = arith.constant 0 : i32
    %c0_i32_0 = arith.constant 0 : i32
    %c0_i32_1 = arith.constant 0 : i32
    return %c0_i32, %c0_i32_0 : i32, i32
  }
  func.func @transform_3(%arg0: i32) -> (i32, i32) {
    %c0_i32 = arith.constant 0 : i32
    %c0_i32_0 = arith.constant 0 : i32
    return %arg0, %c0_i32 : i32, i32
  }
}

module attributes {stable_mosaic.version = 11 : i64} {
  func.func @_conv_bn_fused_kernel(%arg0: i32, %arg1: memref<128x128xbf16, #tpu.memory_space<vmem>>, %arg2: memref<128x128xbf16, #tpu.memory_space<vmem>>, %arg3: memref<1x128xf32, #tpu.memory_space<vmem>>, %arg4: memref<1x128xf32, #tpu.memory_space<vmem>>, %arg5: memref<128x128xbf16, #tpu.memory_space<vmem>>) attributes {dimension_semantics = [#tpu.dimension_semantics<arbitrary>], iteration_bounds = array<i64: 1>, scalar_prefetch = 0 : i64, scratch_operands = 0 : i64, tpu.core_type = #tpu.core_type<tc>, window_params = [{transform_indices = @transform_0, window_bounds = array<i64: 128, 128>}, {pipeline_mode = #tpu.pipeline_mode<synchronous>, transform_indices = @transform_1, window_bounds = array<i64: 128, 128>}, {pipeline_mode = #tpu.pipeline_mode<synchronous>, transform_indices = @transform_2, window_bounds = array<i64: 1, 128>}, {pipeline_mode = #tpu.pipeline_mode<synchronous>, transform_indices = @transform_3, window_bounds = array<i64: 1, 128>}, {transform_indices = @transform_4, window_bounds = array<i64: 128, 128>}]} {
    %c0 = arith.constant 0 : index
    %c0_0 = arith.constant 0 : index
    %0 = vector.load %arg1[%c0, %c0_0] : memref<128x128xbf16, #tpu.memory_space<vmem>>, vector<128x128xbf16>
    %c0_1 = arith.constant 0 : index
    %c0_2 = arith.constant 0 : index
    %1 = vector.load %arg2[%c0_1, %c0_2] : memref<128x128xbf16, #tpu.memory_space<vmem>>, vector<128x128xbf16>
    %cst = arith.constant dense<0.000000e+00> : vector<128x128xf32>
    %2 = tpu.matmul %0, %1, %cst {dimension_numbers = #tpu.dot_dimension_numbers<[1], [0], [0], [1], [0, 0, 1, 1], [], []>} : vector<128x128xbf16>, vector<128x128xbf16>, vector<128x128xf32> -> vector<128x128xf32>
    %cst_3 = arith.constant dense<0.000000e+00> : vector<128xf32>
    %3 = vector.multi_reduction <add>, %2, %cst_3 [0] : vector<128x128xf32> to vector<128xf32>
    %4 = vector.shape_cast %3 : vector<128xf32> to vector<1x128xf32>
    %cst_4 = arith.constant 7.812500e-03 : f32
    %5 = vector.broadcast %cst_4 : f32 to vector<1x128xf32>
    %6 = arith.mulf %4, %5 : vector<1x128xf32>
    %7 = arith.mulf %2, %2 : vector<128x128xf32>
    %cst_5 = arith.constant dense<0.000000e+00> : vector<128xf32>
    %8 = vector.multi_reduction <add>, %7, %cst_5 [0] : vector<128x128xf32> to vector<128xf32>
    %9 = vector.shape_cast %8 : vector<128xf32> to vector<1x128xf32>
    %cst_6 = arith.constant 7.812500e-03 : f32
    %10 = vector.broadcast %cst_6 : f32 to vector<1x128xf32>
    %11 = arith.mulf %9, %10 : vector<1x128xf32>
    %12 = arith.mulf %6, %6 : vector<1x128xf32>
    %13 = arith.subf %11, %12 : vector<1x128xf32>
    %c0_7 = arith.constant 0 : index
    %c0_8 = arith.constant 0 : index
    %14 = vector.load %arg3[%c0_7, %c0_8] : memref<1x128xf32, #tpu.memory_space<vmem>>, vector<1x128xf32>
    %cst_9 = arith.constant 9.99999974E-6 : f32
    %15 = vector.broadcast %cst_9 : f32 to vector<1x128xf32>
    %16 = arith.addf %13, %15 : vector<1x128xf32>
    %17 = math.rsqrt %16 : vector<1x128xf32>
    %18 = arith.mulf %14, %17 : vector<1x128xf32>
    %19 = vector.broadcast %6 : vector<1x128xf32> to vector<128x128xf32>
    %20 = arith.subf %2, %19 : vector<128x128xf32>
    %21 = vector.broadcast %18 : vector<1x128xf32> to vector<128x128xf32>
    %22 = arith.mulf %20, %21 : vector<128x128xf32>
    %c0_10 = arith.constant 0 : index
    %c0_11 = arith.constant 0 : index
    %23 = vector.load %arg4[%c0_10, %c0_11] : memref<1x128xf32, #tpu.memory_space<vmem>>, vector<1x128xf32>
    %24 = vector.broadcast %23 : vector<1x128xf32> to vector<128x128xf32>
    %25 = arith.addf %22, %24 : vector<128x128xf32>
    %cst_12 = arith.constant 0.000000e+00 : f32
    %26 = vector.broadcast %cst_12 : f32 to vector<128x128xf32>
    %27 = arith.cmpf oge, %25, %26 : vector<128x128xf32>
    %cst_13 = arith.constant 2.000000e-01 : f32
    %28 = vector.broadcast %cst_13 : f32 to vector<128x128xf32>
    %29 = arith.mulf %28, %25 : vector<128x128xf32>
    %30 = arith.select %27, %25, %29 : vector<128x128xi1>, vector<128x128xf32>
    %31 = arith.truncf %30 : vector<128x128xf32> to vector<128x128xbf16>
    %c0_14 = arith.constant 0 : index
    %c0_15 = arith.constant 0 : index
    %32 = vector.load %arg5[%c0_14, %c0_15] : memref<128x128xbf16, #tpu.memory_space<vmem>>, vector<128x128xbf16>
    tpu.vector_store %arg5[%c0_14, %c0_15], %31 {strides = array<i32>} : memref<128x128xbf16, #tpu.memory_space<vmem>>, vector<128x128xbf16>,
    return
  }
  func.func @transform_0(%arg0: i32) -> (i32, i32) {
    %c0_i32 = arith.constant 0 : i32
    %c0_i32_0 = arith.constant 0 : i32
    return %arg0, %c0_i32 : i32, i32
  }
  func.func @transform_1(%arg0: i32) -> (i32, i32) {
    %c0_i32 = arith.constant 0 : i32
    %c0_i32_0 = arith.constant 0 : i32
    %c0_i32_1 = arith.constant 0 : i32
    return %c0_i32, %c0_i32_0 : i32, i32
  }
  func.func @transform_2(%arg0: i32) -> (i32, i32) {
    %c0_i32 = arith.constant 0 : i32
    %c0_i32_0 = arith.constant 0 : i32
    %c0_i32_1 = arith.constant 0 : i32
    return %c0_i32, %c0_i32_0 : i32, i32
  }
  func.func @transform_3(%arg0: i32) -> (i32, i32) {
    %c0_i32 = arith.constant 0 : i32
    %c0_i32_0 = arith.constant 0 : i32
    %c0_i32_1 = arith.constant 0 : i32
    return %c0_i32, %c0_i32_0 : i32, i32
  }
  func.func @transform_4(%arg0: i32) -> (i32, i32) {
    %c0_i32 = arith.constant 0 : i32
    %c0_i32_0 = arith.constant 0 : i32
    return %arg0, %c0_i32 : i32, i32
  }
}

module attributes {stable_mosaic.version = 11 : i64} {
  func.func @_conv_bn_fused_kernel(%arg0: i32, %arg1: memref<32x128xbf16, #tpu.memory_space<vmem>>, %arg2: memref<128x128xbf16, #tpu.memory_space<vmem>>, %arg3: memref<1x128xf32, #tpu.memory_space<vmem>>, %arg4: memref<1x128xf32, #tpu.memory_space<vmem>>, %arg5: memref<32x128xbf16, #tpu.memory_space<vmem>>) attributes {dimension_semantics = [#tpu.dimension_semantics<arbitrary>], iteration_bounds = array<i64: 1>, scalar_prefetch = 0 : i64, scratch_operands = 0 : i64, tpu.core_type = #tpu.core_type<tc>, window_params = [{transform_indices = @transform_0, window_bounds = array<i64: 32, 128>}, {pipeline_mode = #tpu.pipeline_mode<synchronous>, transform_indices = @transform_1, window_bounds = array<i64: 128, 128>}, {pipeline_mode = #tpu.pipeline_mode<synchronous>, transform_indices = @transform_2, window_bounds = array<i64: 1, 128>}, {pipeline_mode = #tpu.pipeline_mode<synchronous>, transform_indices = @transform_3, window_bounds = array<i64: 1, 128>}, {transform_indices = @transform_4, window_bounds = array<i64: 32, 128>}]} {
    %c0 = arith.constant 0 : index
    %c0_0 = arith.constant 0 : index
    %0 = vector.load %arg1[%c0, %c0_0] : memref<32x128xbf16, #tpu.memory_space<vmem>>, vector<32x128xbf16>
    %c0_1 = arith.constant 0 : index
    %c0_2 = arith.constant 0 : index
    %1 = vector.load %arg2[%c0_1, %c0_2] : memref<128x128xbf16, #tpu.memory_space<vmem>>, vector<128x128xbf16>
    %cst = arith.constant dense<0.000000e+00> : vector<32x128xf32>
    %2 = tpu.matmul %0, %1, %cst {dimension_numbers = #tpu.dot_dimension_numbers<[1], [0], [0], [1], [0, 0, 1, 1], [], []>} : vector<32x128xbf16>, vector<128x128xbf16>, vector<32x128xf32> -> vector<32x128xf32>
    %cst_3 = arith.constant dense<0.000000e+00> : vector<128xf32>
    %3 = vector.multi_reduction <add>, %2, %cst_3 [0] : vector<32x128xf32> to vector<128xf32>
    %4 = vector.shape_cast %3 : vector<128xf32> to vector<1x128xf32>
    %cst_4 = arith.constant 3.125000e-02 : f32
    %5 = vector.broadcast %cst_4 : f32 to vector<1x128xf32>
    %6 = arith.mulf %4, %5 : vector<1x128xf32>
    %7 = arith.mulf %2, %2 : vector<32x128xf32>
    %cst_5 = arith.constant dense<0.000000e+00> : vector<128xf32>
    %8 = vector.multi_reduction <add>, %7, %cst_5 [0] : vector<32x128xf32> to vector<128xf32>
    %9 = vector.shape_cast %8 : vector<128xf32> to vector<1x128xf32>
    %cst_6 = arith.constant 3.125000e-02 : f32
    %10 = vector.broadcast %cst_6 : f32 to vector<1x128xf32>
    %11 = arith.mulf %9, %10 : vector<1x128xf32>
    %12 = arith.mulf %6, %6 : vector<1x128xf32>
    %13 = arith.subf %11, %12 : vector<1x128xf32>
    %c0_7 = arith.constant 0 : index
    %c0_8 = arith.constant 0 : index
    %14 = vector.load %arg3[%c0_7, %c0_8] : memref<1x128xf32, #tpu.memory_space<vmem>>, vector<1x128xf32>
    %cst_9 = arith.constant 9.99999974E-6 : f32
    %15 = vector.broadcast %cst_9 : f32 to vector<1x128xf32>
    %16 = arith.addf %13, %15 : vector<1x128xf32>
    %17 = math.rsqrt %16 : vector<1x128xf32>
    %18 = arith.mulf %14, %17 : vector<1x128xf32>
    %19 = vector.broadcast %6 : vector<1x128xf32> to vector<32x128xf32>
    %20 = arith.subf %2, %19 : vector<32x128xf32>
    %21 = vector.broadcast %18 : vector<1x128xf32> to vector<32x128xf32>
    %22 = arith.mulf %20, %21 : vector<32x128xf32>
    %c0_10 = arith.constant 0 : index
    %c0_11 = arith.constant 0 : index
    %23 = vector.load %arg4[%c0_10, %c0_11] : memref<1x128xf32, #tpu.memory_space<vmem>>, vector<1x128xf32>
    %24 = vector.broadcast %23 : vector<1x128xf32> to vector<32x128xf32>
    %25 = arith.addf %22, %24 : vector<32x128xf32>
    %cst_12 = arith.constant 0.000000e+00 : f32
    %26 = vector.broadcast %cst_12 : f32 to vector<32x128xf32>
    %27 = arith.cmpf oge, %25, %26 : vector<32x128xf32>
    %cst_13 = arith.constant 2.000000e-01 : f32
    %28 = vector.broadcast %cst_13 : f32 to vector<32x128xf32>
    %29 = arith.mulf %28, %25 : vector<32x128xf32>
    %30 = arith.select %27, %25, %29 : vector<32x128xi1>, vector<32x128xf32>
    %31 = arith.truncf %30 : vector<32x128xf32> to vector<32x128xbf16>
    %c0_14 = arith.constant 0 : index
    %c0_15 = arith.constant 0 : index
    %32 = vector.load %arg5[%c0_14, %c0_15] : memref<32x128xbf16, #tpu.memory_space<vmem>>, vector<32x128xbf16>
    tpu.vector_store %arg5[%c0_14, %c0_15], %31 {strides = array<i32>} : memref<32x128xbf16, #tpu.memory_space<vmem>>, vector<32x128xbf16>,
    return
  }
  func.func @transform_0(%arg0: i32) -> (i32, i32) {
    %c0_i32 = arith.constant 0 : i32
    %c0_i32_0 = arith.constant 0 : i32
    return %arg0, %c0_i32 : i32, i32
  }
  func.func @transform_1(%arg0: i32) -> (i32, i32) {
    %c0_i32 = arith.constant 0 : i32
    %c0_i32_0 = arith.constant 0 : i32
    %c0_i32_1 = arith.constant 0 : i32
    return %c0_i32, %c0_i32_0 : i32, i32
  }
  func.func @transform_2(%arg0: i32) -> (i32, i32) {
    %c0_i32 = arith.constant 0 : i32
    %c0_i32_0 = arith.constant 0 : i32
    %c0_i32_1 = arith.constant 0 : i32
    return %c0_i32, %c0_i32_0 : i32, i32
  }
  func.func @transform_3(%arg0: i32) -> (i32, i32) {
    %c0_i32 = arith.constant 0 : i32
    %c0_i32_0 = arith.constant 0 : i32
    %c0_i32_1 = arith.constant 0 : i32
    return %c0_i32, %c0_i32_0 : i32, i32
  }
  func.func @transform_4(%arg0: i32) -> (i32, i32) {
    %c0_i32 = arith.constant 0 : i32
    %c0_i32_0 = arith.constant 0 : i32
    return %arg0, %c0_i32 : i32, i32
  }
}

module attributes {stable_mosaic.version = 11 : i64} {
  func.func @_conv_bn_fused_kernel(%arg0: i32, %arg1: memref<32x256xbf16, #tpu.memory_space<vmem>>, %arg2: memref<256x128xbf16, #tpu.memory_space<vmem>>, %arg3: memref<1x128xf32, #tpu.memory_space<vmem>>, %arg4: memref<1x128xf32, #tpu.memory_space<vmem>>, %arg5: memref<32x128xbf16, #tpu.memory_space<vmem>>) attributes {dimension_semantics = [#tpu.dimension_semantics<arbitrary>], iteration_bounds = array<i64: 1>, scalar_prefetch = 0 : i64, scratch_operands = 0 : i64, tpu.core_type = #tpu.core_type<tc>, window_params = [{transform_indices = @transform_0, window_bounds = array<i64: 32, 256>}, {pipeline_mode = #tpu.pipeline_mode<synchronous>, transform_indices = @transform_1, window_bounds = array<i64: 256, 128>}, {pipeline_mode = #tpu.pipeline_mode<synchronous>, transform_indices = @transform_2, window_bounds = array<i64: 1, 128>}, {pipeline_mode = #tpu.pipeline_mode<synchronous>, transform_indices = @transform_3, window_bounds = array<i64: 1, 128>}, {transform_indices = @transform_4, window_bounds = array<i64: 32, 128>}]} {
    %c0 = arith.constant 0 : index
    %c0_0 = arith.constant 0 : index
    %0 = vector.load %arg1[%c0, %c0_0] : memref<32x256xbf16, #tpu.memory_space<vmem>>, vector<32x256xbf16>
    %c0_1 = arith.constant 0 : index
    %c0_2 = arith.constant 0 : index
    %1 = vector.load %arg2[%c0_1, %c0_2] : memref<256x128xbf16, #tpu.memory_space<vmem>>, vector<256x128xbf16>
    %cst = arith.constant dense<0.000000e+00> : vector<32x128xf32>
    %2 = tpu.matmul %0, %1, %cst {dimension_numbers = #tpu.dot_dimension_numbers<[1], [0], [0], [1], [0, 0, 1, 1], [], []>} : vector<32x256xbf16>, vector<256x128xbf16>, vector<32x128xf32> -> vector<32x128xf32>
    %cst_3 = arith.constant dense<0.000000e+00> : vector<128xf32>
    %3 = vector.multi_reduction <add>, %2, %cst_3 [0] : vector<32x128xf32> to vector<128xf32>
    %4 = vector.shape_cast %3 : vector<128xf32> to vector<1x128xf32>
    %cst_4 = arith.constant 0.055555556 : f32
    %5 = vector.broadcast %cst_4 : f32 to vector<1x128xf32>
    %6 = arith.mulf %4, %5 : vector<1x128xf32>
    %7 = arith.mulf %2, %2 : vector<32x128xf32>
    %cst_5 = arith.constant dense<0.000000e+00> : vector<128xf32>
    %8 = vector.multi_reduction <add>, %7, %cst_5 [0] : vector<32x128xf32> to vector<128xf32>
    %9 = vector.shape_cast %8 : vector<128xf32> to vector<1x128xf32>
    %cst_6 = arith.constant 0.055555556 : f32
    %10 = vector.broadcast %cst_6 : f32 to vector<1x128xf32>
    %11 = arith.mulf %9, %10 : vector<1x128xf32>
    %12 = arith.mulf %6, %6 : vector<1x128xf32>
    %13 = arith.subf %11, %12 : vector<1x128xf32>
    %c0_7 = arith.constant 0 : index
    %c0_8 = arith.constant 0 : index
    %14 = vector.load %arg3[%c0_7, %c0_8] : memref<1x128xf32, #tpu.memory_space<vmem>>, vector<1x128xf32>
    %cst_9 = arith.constant 9.99999974E-6 : f32
    %15 = vector.broadcast %cst_9 : f32 to vector<1x128xf32>
    %16 = arith.addf %13, %15 : vector<1x128xf32>
    %17 = math.rsqrt %16 : vector<1x128xf32>
    %18 = arith.mulf %14, %17 : vector<1x128xf32>
    %19 = vector.broadcast %6 : vector<1x128xf32> to vector<32x128xf32>
    %20 = arith.subf %2, %19 : vector<32x128xf32>
    %21 = vector.broadcast %18 : vector<1x128xf32> to vector<32x128xf32>
    %22 = arith.mulf %20, %21 : vector<32x128xf32>
    %c0_10 = arith.constant 0 : index
    %c0_11 = arith.constant 0 : index
    %23 = vector.load %arg4[%c0_10, %c0_11] : memref<1x128xf32, #tpu.memory_space<vmem>>, vector<1x128xf32>
    %24 = vector.broadcast %23 : vector<1x128xf32> to vector<32x128xf32>
    %25 = arith.addf %22, %24 : vector<32x128xf32>
    %cst_12 = arith.constant 0.000000e+00 : f32
    %26 = vector.broadcast %cst_12 : f32 to vector<32x128xf32>
    %27 = arith.cmpf oge, %25, %26 : vector<32x128xf32>
    %cst_13 = arith.constant 2.000000e-01 : f32
    %28 = vector.broadcast %cst_13 : f32 to vector<32x128xf32>
    %29 = arith.mulf %28, %25 : vector<32x128xf32>
    %30 = arith.select %27, %25, %29 : vector<32x128xi1>, vector<32x128xf32>
    %31 = arith.truncf %30 : vector<32x128xf32> to vector<32x128xbf16>
    %c0_14 = arith.constant 0 : index
    %c0_15 = arith.constant 0 : index
    %32 = vector.load %arg5[%c0_14, %c0_15] : memref<32x128xbf16, #tpu.memory_space<vmem>>, vector<32x128xbf16>
    tpu.vector_store %arg5[%c0_14, %c0_15], %31 {strides = array<i32>} : memref<32x128xbf16, #tpu.memory_space<vmem>>, vector<32x128xbf16>,
    return
  }
  func.func @transform_0(%arg0: i32) -> (i32, i32) {
    %c0_i32 = arith.constant 0 : i32
    %c0_i32_0 = arith.constant 0 : i32
    return %arg0, %c0_i32 : i32, i32
  }
  func.func @transform_1(%arg0: i32) -> (i32, i32) {
    %c0_i32 = arith.constant 0 : i32
    %c0_i32_0 = arith.constant 0 : i32
    %c0_i32_1 = arith.constant 0 : i32
    return %c0_i32, %c0_i32_0 : i32, i32
  }
  func.func @transform_2(%arg0: i32) -> (i32, i32) {
    %c0_i32 = arith.constant 0 : i32
    %c0_i32_0 = arith.constant 0 : i32
    %c0_i32_1 = arith.constant 0 : i32
    return %c0_i32, %c0_i32_0 : i32, i32
  }
  func.func @transform_3(%arg0: i32) -> (i32, i32) {
    %c0_i32 = arith.constant 0 : i32
    %c0_i32_0 = arith.constant 0 : i32
    %c0_i32_1 = arith.constant 0 : i32
    return %c0_i32, %c0_i32_0 : i32, i32
  }
  func.func @transform_4(%arg0: i32) -> (i32, i32) {
    %c0_i32 = arith.constant 0 : i32
    %c0_i32_0 = arith.constant 0 : i32
    return %arg0, %c0_i32 : i32, i32
  }
}

module attributes {stable_mosaic.version = 11 : i64} {
  func.func @_conv_bias_act_kernel(%arg0: i32, %arg1: memref<16x512xbf16, #tpu.memory_space<vmem>>, %arg2: memref<512x128xbf16, #tpu.memory_space<vmem>>, %arg3: memref<1x128xf32, #tpu.memory_space<vmem>>, %arg4: memref<16x128xf32, #tpu.memory_space<vmem>>) attributes {dimension_semantics = [#tpu.dimension_semantics<parallel>], iteration_bounds = array<i64: 1>, scalar_prefetch = 0 : i64, scratch_operands = 0 : i64, tpu.core_type = #tpu.core_type<tc>, window_params = [{transform_indices = @transform_0, window_bounds = array<i64: 16, 512>}, {pipeline_mode = #tpu.pipeline_mode<synchronous>, transform_indices = @transform_1, window_bounds = array<i64: 512, 128>}, {pipeline_mode = #tpu.pipeline_mode<synchronous>, transform_indices = @transform_2, window_bounds = array<i64: 1, 128>}, {transform_indices = @transform_3, window_bounds = array<i64: 16, 128>}]} {
    %c0 = arith.constant 0 : index
    %c0_0 = arith.constant 0 : index
    %0 = vector.load %arg1[%c0, %c0_0] : memref<16x512xbf16, #tpu.memory_space<vmem>>, vector<16x512xbf16>
    %c0_1 = arith.constant 0 : index
    %c0_2 = arith.constant 0 : index
    %1 = vector.load %arg2[%c0_1, %c0_2] : memref<512x128xbf16, #tpu.memory_space<vmem>>, vector<512x128xbf16>
    %cst = arith.constant dense<0.000000e+00> : vector<16x128xf32>
    %2 = tpu.matmul %0, %1, %cst {dimension_numbers = #tpu.dot_dimension_numbers<[1], [0], [0], [1], [0, 0, 1, 1], [], []>} : vector<16x512xbf16>, vector<512x128xbf16>, vector<16x128xf32> -> vector<16x128xf32>
    %c0_3 = arith.constant 0 : index
    %c0_4 = arith.constant 0 : index
    %3 = vector.load %arg3[%c0_3, %c0_4] : memref<1x128xf32, #tpu.memory_space<vmem>>, vector<1x128xf32>
    %4 = vector.broadcast %3 : vector<1x128xf32> to vector<16x128xf32>
    %5 = arith.addf %2, %4 : vector<16x128xf32>
    %cst_5 = arith.constant 0.000000e+00 : f32
    %6 = vector.broadcast %cst_5 : f32 to vector<16x128xf32>
    %7 = arith.subf %6, %5 : vector<16x128xf32>
    %8 = math.exp %7 : vector<16x128xf32>
    %cst_6 = arith.constant 1.000000e+00 : f32
    %9 = vector.broadcast %cst_6 : f32 to vector<16x128xf32>
    %10 = arith.addf %9, %8 : vector<16x128xf32>
    %cst_7 = arith.constant 1.000000e+00 : f32
    %11 = vector.broadcast %cst_7 : f32 to vector<16x128xf32>
    %12 = arith.divf %11, %10 : vector<16x128xf32>
    %c0_8 = arith.constant 0 : index
    %c0_9 = arith.constant 0 : index
    %13 = vector.load %arg4[%c0_8, %c0_9] : memref<16x128xf32, #tpu.memory_space<vmem>>, vector<16x128xf32>
    tpu.vector_store %arg4[%c0_8, %c0_9], %12 {strides = array<i32>} : memref<16x128xf32, #tpu.memory_space<vmem>>, vector<16x128xf32>,
    return
  }
  func.func @transform_0(%arg0: i32) -> (i32, i32) {
    %c0_i32 = arith.constant 0 : i32
    %c0_i32_0 = arith.constant 0 : i32
    return %arg0, %c0_i32 : i32, i32
  }
  func.func @transform_1(%arg0: i32) -> (i32, i32) {
    %c0_i32 = arith.constant 0 : i32
    %c0_i32_0 = arith.constant 0 : i32
    %c0_i32_1 = arith.constant 0 : i32
    return %c0_i32, %c0_i32_0 : i32, i32
  }
  func.func @transform_2(%arg0: i32) -> (i32, i32) {
    %c0_i32 = arith.constant 0 : i32
    %c0_i32_0 = arith.constant 0 : i32
    %c0_i32_1 = arith.constant 0 : i32
    return %c0_i32, %c0_i32_0 : i32, i32
  }
  func.func @transform_3(%arg0: i32) -> (i32, i32) {
    %c0_i32 = arith.constant 0 : i32
    %c0_i32_0 = arith.constant 0 : i32
    return %arg0, %c0_i32 : i32, i32
  }
}

</mosaic_0001>

<bundles_post_ra>
// kernel: discriminator_forward.5
= control target key start
LH: loop header
LB: loop body
LE: loop exit
PB: predicated region body
PF: predicated region fallthrough
CT: control target
= control target key end

     0   :  { %s1552_s1 = inlined_call_operand.vmem [shape: bf16[128,128], index: 1, kind: input, shape index: {}]   ;;  %s1553_s2 = inlined_call_operand.vmem [shape: f32[1,128], index: 2, kind: input, shape index: {}]   ;;  %s1554_s0 = inlined_call_operand.vmem [shape: bf16[512,128], index: 0, kind: input, shape index: {}]   ;;  %s1555_s3 = inlined_call_operand.vmem [shape: bf16[512,128], index: 3, kind: output, shape index: {}]  }
   0x1   :  { %v1030_v0 = vld [vmem:[%s1552_s1 + $0x38] sm:$0xff]  ;;  %v1029_v1 = vld [vmem:[%s1552_s1 + $0x30] sm:$0xff]  ;;  %v1028_v2 = vld [vmem:[%s1552_s1 + $0x28] sm:$0xff] }
   0x2   :  { %338 = vmatpush.bf16.msra.mxu0 %v1030_v0  ;;  %1222 = vmatpush.bf16.msra.mxu1 %v1030_v0  ;;  %v1027_v3 = vld [vmem:[%s1552_s1 + $0x20] sm:$0xff]  ;;  %v1026_v4 = vld [vmem:[%s1552_s1 + $0x18] sm:$0xff]  ;;  %v1025_v5 = vld [vmem:[%s1552_s1 + $0x10] sm:$0xff] }
   0x3   :  { %1223 = vmatpush.bf16.msra.mxu2 %v1030_v0  ;;  %1224 = vmatpush.bf16.msra.mxu3 %v1030_v0  ;;  %v1024_v6 = vld [vmem:[%s1552_s1 + $0x8] sm:$0xff]  ;;  %v1023_v7 = vld [vmem:[%s1552_s1] sm:$0xff]  ;;  %v993_v16 = vld [vmem:[%s1554_s0 + $0x10] sm:$0xff] }
   0x4   :  { %v991_v8 = vld [vmem:[%s1554_s0] sm:$0xff]  ;;  %v992_v12 = vld [vmem:[%s1554_s0 + $0x8] sm:$0xff]  ;;  %v1001_v17 = vld [vmem:[%s1554_s0 + $0x50] sm:$0xff] }
   0x5   :  { %v999_v9 = vld [vmem:[%s1554_s0 + $0x40] sm:$0xff]  ;;  %v1000_v13 = vld [vmem:[%s1554_s0 + $0x48] sm:$0xff]  ;;  %v1009_v18 = vld [vmem:[%s1554_s0 + $0x90] sm:$0xff] }
   0x6   :  { %339 = vmatpush.bf16.msra.mxu0 %v1029_v1  ;;  %1225 = vmatpush.bf16.msra.mxu1 %v1029_v1  ;;  %v1007_v10 = vld [vmem:[%s1554_s0 + $0x80] sm:$0xff]  ;;  %v1008_v14 = vld [vmem:[%s1554_s0 + $0x88] sm:$0xff]  ;;  %v1017_v19 = vld [vmem:[%s1554_s0 + $0xd0] sm:$0xff] }
   0x7   :  { %1226 = vmatpush.bf16.msra.mxu2 %v1029_v1  ;;  %1227 = vmatpush.bf16.msra.mxu3 %v1029_v1  ;;  %v1015_v11 = vld [vmem:[%s1554_s0 + $0xc0] sm:$0xff]  ;;  %v1016_v15 = vld [vmem:[%s1554_s0 + $0xc8] sm:$0xff]  ;;  %v994_v20 = vld [vmem:[%s1554_s0 + $0x18] sm:$0xff] }
   0x8   :  { %v1002_v21 = vld [vmem:[%s1554_s0 + $0x58] sm:$0xff]  ;;  %v995_v24 = vld [vmem:[%s1554_s0 + $0x20] sm:$0xff]  ;;  %v996_v28 = vld [vmem:[%s1554_s0 + $0x28] sm:$0xff] }
   0x9   :  { %v1010_v22 = vld [vmem:[%s1554_s0 + $0x98] sm:$0xff]  ;;  %v1003_v25 = vld [vmem:[%s1554_s0 + $0x60] sm:$0xff]  ;;  %v1004_v29 = vld [vmem:[%s1554_s0 + $0x68] sm:$0xff] }
   0xa   :  { %340 = vmatpush.bf16.msra.mxu0 %v1028_v2  ;;  %1228 = vmatpush.bf16.msra.mxu1 %v1028_v2  ;;  %v1018_v23 = vld [vmem:[%s1554_s0 + $0xd8] sm:$0xff]  ;;  %v1011_v26 = vld [vmem:[%s1554_s0 + $0xa0] sm:$0xff]  ;;  %v1012_v30 = vld [vmem:[%s1554_s0 + $0xa8] sm:$0xff] }
   0xb   :  { %1229 = vmatpush.bf16.msra.mxu2 %v1028_v2  ;;  %1230 = vmatpush.bf16.msra.mxu3 %v1028_v2  ;;  %v1019_v27 = vld [vmem:[%s1554_s0 + $0xe0] sm:$0xff]  ;;  %v1020_v31 = vld [vmem:[%s1554_s0 + $0xe8] sm:$0xff]  ;;  %v997_v32 = vld [vmem:[%s1554_s0 + $0x30] sm:$0xff] }
   0xc   :  { %v1005_v33 = vld [vmem:[%s1554_s0 + $0x70] sm:$0xff]  ;;  %v998_v36 = vld [vmem:[%s1554_s0 + $0x38] sm:$0xff]  ;;  %v1390_v42 = vld [vmem:[%s1553_s2] ss:$0 sm:$0xff] }
   0xd   :  { %v1013_v34 = vld [vmem:[%s1554_s0 + $0xb0] sm:$0xff]  ;;  %v1006_v37 = vld [vmem:[%s1554_s0 + $0x78] sm:$0xff] }
   0xe   :  { %341 = vmatpush.bf16.msra.mxu0 %v1027_v3  ;;  %1231 = vmatpush.bf16.msra.mxu1 %v1027_v3  ;;  %v1021_v35 = vld [vmem:[%s1554_s0 + $0xf0] sm:$0xff]  ;;  %v1014_v38 = vld [vmem:[%s1554_s0 + $0xb8] sm:$0xff] }
   0xf   :  { %1232 = vmatpush.bf16.msra.mxu2 %v1027_v3  ;;  %1233 = vmatpush.bf16.msra.mxu3 %v1027_v3  ;;  %v1022_v39 = vld [vmem:[%s1554_s0 + $0xf8] sm:$0xff] }
  0x12   :  { %342 = vmatpush.bf16.msra.mxu0 %v1026_v4  ;;  %1234 = vmatpush.bf16.msra.mxu1 %v1026_v4 }
  0x13   :  { %1235 = vmatpush.bf16.msra.mxu2 %v1026_v4  ;;  %1236 = vmatpush.bf16.msra.mxu3 %v1026_v4 }
  0x16   :  { %343 = vmatpush.bf16.msra.mxu0 %v1025_v5  ;;  %1237 = vmatpush.bf16.msra.mxu1 %v1025_v5 }
  0x17   :  { %1238 = vmatpush.bf16.msra.mxu2 %v1025_v5  ;;  %1239 = vmatpush.bf16.msra.mxu3 %v1025_v5 }
  0x1a   :  { %344 = vmatpush.bf16.msra.mxu0 %v1024_v6  ;;  %1240 = vmatpush.bf16.msra.mxu1 %v1024_v6 }
  0x1b   :  { %1241 = vmatpush.bf16.msra.mxu2 %v1024_v6  ;;  %1242 = vmatpush.bf16.msra.mxu3 %v1024_v6 }
  0x1e   :  { %345 = vmatpush.bf16.msra.mxu0 %v1023_v7  ;;  %1243 = vmatpush.bf16.msra.mxu1 %v1023_v7 }
  0x1f   :  { %1244 = vmatpush.bf16.msra.mxu2 %v1023_v7  ;;  %1245 = vmatpush.bf16.msra.mxu3 %v1023_v7 }
  0x21   :  { %346 = vmatmul.bf16.vlgmr.msra.gmra.mxu0 %v991_v8  ;;  %386 = vmatmul.bf16.vlgmr.msra.gmra.mxu1 %v999_v9 }
  0x22   :  { %426 = vmatmul.bf16.vlgmr.msra.gmra.mxu2 %v1007_v10  ;;  %466 = vmatmul.bf16.vlgmr.msra.gmra.mxu3 %v1015_v11 }
  0x31   :  { %351 = vmatmul.bf16.gmra.mxu0 %v992_v12  ;;  %391 = vmatmul.bf16.gmra.mxu1 %v1000_v13 }
  0x32   :  { %431 = vmatmul.bf16.gmra.mxu2 %v1008_v14  ;;  %471 = vmatmul.bf16.gmra.mxu3 %v1016_v15 }
  0x41   :  { %356 = vmatmul.bf16.gmra.mxu0 %v993_v16  ;;  %396 = vmatmul.bf16.gmra.mxu1 %v1001_v17 }
  0x42   :  { %436 = vmatmul.bf16.gmra.mxu2 %v1009_v18  ;;  %476 = vmatmul.bf16.gmra.mxu3 %v1017_v19 }
  0x51   :  { %361 = vmatmul.bf16.gmra.mxu0 %v994_v20  ;;  %401 = vmatmul.bf16.gmra.mxu1 %v1002_v21 }
  0x52   :  { %441 = vmatmul.bf16.gmra.mxu2 %v1010_v22  ;;  %481 = vmatmul.bf16.gmra.mxu3 %v1018_v23 }
  0x61   :  { %366 = vmatmul.bf16.gmra.mxu0 %v995_v24  ;;  %406 = vmatmul.bf16.gmra.mxu1 %v1003_v25 }
  0x62   :  { %446 = vmatmul.bf16.gmra.mxu2 %v1011_v26  ;;  %486 = vmatmul.bf16.gmra.mxu3 %v1019_v27 }
  0x71   :  { %371 = vmatmul.bf16.gmra.mxu0 %v996_v28  ;;  %411 = vmatmul.bf16.gmra.mxu1 %v1004_v29 }
  0x72   :  { %451 = vmatmul.bf16.gmra.mxu2 %v1012_v30  ;;  %491 = vmatmul.bf16.gmra.mxu3 %v1020_v31 }
  0x81   :  { %376 = vmatmul.bf16.gmra.mxu0 %v997_v32  ;;  %416 = vmatmul.bf16.gmra.mxu1 %v1005_v33 }
  0x82   :  { %456 = vmatmul.bf16.gmra.mxu2 %v1013_v34  ;;  %496 = vmatmul.bf16.gmra.mxu3 %v1021_v35 }
  0x91   :  { %381 = vmatmul.bf16.gmra.mxu0 %v998_v36  ;;  %421 = vmatmul.bf16.gmra.mxu1 %v1006_v37 }
  0x92   :  { %461 = vmatmul.bf16.gmra.mxu2 %v1014_v38  ;;  %501 = vmatmul.bf16.gmra.mxu3 %v1022_v39 }
  0x9e   :  { %v347_v40 = vpop.f32.mrf.mxu0  ;;  %v387_v41 = vpop.f32.mrf.mxu1 }
  0x9f   :  { %v348_v43 = vadd.f32 %v1390_v42, %v347_v40  ;;  %v388_v44 = vadd.f32 %v1390_v42, %v387_v41 }
  0xa1   :  { %v571_v49 = vmul.f32 0.2, %v348_v43  ;;  %v587_v50 = vmul.f32 0.2, %v388_v44  ;;  %vm507_vm0 = vcmp.ge.f32.partialorder %v348_v43, 0.0  ;;  %vm523_vm1 = vcmp.ge.f32.partialorder %v388_v44, 0.0 }
  0xa3   :  { %v635_v57 = vsel %vm507_vm0, %v348_v43, %v571_v49  ;;  %v651_v58 = vsel %vm523_vm1, %v388_v44, %v587_v50 }
  0xa5   :  { %v427_v45 = vpop.f32.mrf.mxu2  ;;  %v467_v46 = vpop.f32.mrf.mxu3 }
  0xa6   :  { %v349_v47 = vpop.f32.mrf.mxu0  ;;  %v389_v48 = vpop.f32.mrf.mxu1  ;;  %v428_v55 = vadd.f32 %v1390_v42, %v427_v45  ;;  %v468_v56 = vadd.f32 %v1390_v42, %v467_v46 }
  0xa7   :  { %v350_v51 = vadd.f32 %v1390_v42, %v349_v47  ;;  %v390_v52 = vadd.f32 %v1390_v42, %v389_v48 }
  0xa8   :  { %v603_v1 = vmul.f32 0.2, %v428_v55  ;;  %v619_v2 = vmul.f32 0.2, %v468_v56  ;;  %vm539_vm4 = vcmp.ge.f32.partialorder %v428_v55, 0.0  ;;  %vm555_vm5 = vcmp.ge.f32.partialorder %v468_v56, 0.0 }
  0xa9   :  { %vm508_vm2 = vcmp.ge.f32.partialorder %v350_v51, 0.0  ;;  %v572_v53 = vmul.f32 0.2, %v350_v51  ;;  %vm524_vm3 = vcmp.ge.f32.partialorder %v390_v52, 0.0  ;;  %v588_v54 = vmul.f32 0.2, %v390_v52 }
  0xaa   :  { %v667_v9 = vsel %vm539_vm4, %v428_v55, %v603_v1  ;;  %v683_v10 = vsel %vm555_vm5, %v468_v56, %v619_v2 }
  0xab   :  { %v636_v59 = vsel %vm508_vm2, %v350_v51, %v572_v53  ;;  %v652_v60 = vsel %vm524_vm3, %v390_v52, %v588_v54 }
  0xac   :  { %v1034_v61 = vpack.c.bf16 %v636_v59, %v635_v57  ;;  %v1074_v62 = vpack.c.bf16 %v652_v60, %v651_v58 }
  0xad   :  { %v429_v63 = vpop.f32.mrf.mxu2  ;;  %v469_v0 = vpop.f32.mrf.mxu3 }
  0xae   :  { %1035 = vst [vmem:[%s1555_s3] sm:$0xff] %v1034_v61   ;;  %v430_v3 = vadd.f32 %v1390_v42, %v429_v63  ;;  %v470_v4 = vadd.f32 %v1390_v42, %v469_v0  ;;  %v352_v5 = vpop.f32.mrf.mxu0  ;;  %v392_v6 = vpop.f32.mrf.mxu1 }
  0xaf   :  { %1198 = vst [vmem:[%s1555_s3 + $0x40] sm:$0xff] %v1074_v62   ;;  %v353_v15 = vadd.f32 %v1390_v42, %v352_v5  ;;  %v393_v16 = vadd.f32 %v1390_v42, %v392_v6 }
  0xb0   :  { %vm540_vm6 = vcmp.ge.f32.partialorder %v430_v3, 0.0  ;;  %v604_v7 = vmul.f32 0.2, %v430_v3  ;;  %vm556_vm7 = vcmp.ge.f32.partialorder %v470_v4, 0.0  ;;  %v620_v8 = vmul.f32 0.2, %v470_v4 }
  0xb1   :  { %v573_v21 = vmul.f32 0.2, %v353_v15  ;;  %v589_v22 = vmul.f32 0.2, %v393_v16  ;;  %vm509_vm8 = vcmp.ge.f32.partialorder %v353_v15, 0.0  ;;  %vm525_vm9 = vcmp.ge.f32.partialorder %v393_v16, 0.0 }
  0xb2   :  { %v668_v11 = vsel %vm540_vm6, %v430_v3, %v604_v7  ;;  %v684_v12 = vsel %vm556_vm7, %v470_v4, %v620_v8 }
  0xb3   :  { %v1114_v13 = vpack.c.bf16 %v668_v11, %v667_v9  ;;  %v1154_v14 = vpack.c.bf16 %v684_v12, %v683_v10  ;;  %v637_v29 = vsel %vm509_vm8, %v353_v15, %v573_v21  ;;  %v653_v30 = vsel %vm525_vm9, %v393_v16, %v589_v22 }
  0xb5   :  { %1206 = vst [vmem:[%s1555_s3 + $0x80] sm:$0xff] %v1114_v13   ;;  %v432_v17 = vpop.f32.mrf.mxu2  ;;  %v472_v18 = vpop.f32.mrf.mxu3 }
  0xb6   :  { %1214 = vst [vmem:[%s1555_s3 + $0xc0] sm:$0xff] %v1154_v14   ;;  %v354_v19 = vpop.f32.mrf.mxu0  ;;  %v394_v20 = vpop.f32.mrf.mxu1  ;;  %v433_v27 = vadd.f32 %v1390_v42, %v432_v17  ;;  %v473_v28 = vadd.f32 %v1390_v42, %v472_v18 }
  0xb7   :  { %v355_v23 = vadd.f32 %v1390_v42, %v354_v19  ;;  %v395_v24 = vadd.f32 %v1390_v42, %v394_v20 }
  0xb8   :  { %v605_v37 = vmul.f32 0.2, %v433_v27  ;;  %v621_v38 = vmul.f32 0.2, %v473_v28  ;;  %vm541_vm12 = vcmp.ge.f32.partialorder %v433_v27, 0.0  ;;  %vm557_vm13 = vcmp.ge.f32.partialorder %v473_v28, 0.0 }
  0xb9   :  { %vm510_vm10 = vcmp.ge.f32.partialorder %v355_v23, 0.0  ;;  %v574_v25 = vmul.f32 0.2, %v355_v23  ;;  %vm526_vm11 = vcmp.ge.f32.partialorder %v395_v24, 0.0  ;;  %v590_v26 = vmul.f32 0.2, %v395_v24 }
  0xba   :  { %v669_v46 = vsel %vm541_vm12, %v433_v27, %v605_v37  ;;  %v685_v47 = vsel %vm557_vm13, %v473_v28, %v621_v38 }
  0xbb   :  { %v638_v31 = vsel %vm510_vm10, %v355_v23, %v574_v25  ;;  %v654_v32 = vsel %vm526_vm11, %v395_v24, %v590_v26 }
  0xbc   :  { %v1039_v33 = vpack.c.bf16 %v638_v31, %v637_v29  ;;  %v1079_v34 = vpack.c.bf16 %v654_v32, %v653_v30 }
  0xbd   :  { %v434_v35 = vpop.f32.mrf.mxu2  ;;  %v474_v36 = vpop.f32.mrf.mxu3 }
  0xbe   :  { %1191 = vst [vmem:[%s1555_s3 + $0x8] sm:$0xff] %v1039_v33   ;;  %v435_v39 = vadd.f32 %v1390_v42, %v434_v35  ;;  %v475_v40 = vadd.f32 %v1390_v42, %v474_v36  ;;  %v357_v41 = vpop.f32.mrf.mxu0  ;;  %v397_v43 = vpop.f32.mrf.mxu1 }
  0xbf   :  { %1199 = vst [vmem:[%s1555_s3 + $0x48] sm:$0xff] %v1079_v34   ;;  %v358_v52 = vadd.f32 %v1390_v42, %v357_v41  ;;  %v398_v53 = vadd.f32 %v1390_v42, %v397_v43 }
  0xc0   :  { %vm542_vm14 = vcmp.ge.f32.partialorder %v435_v39, 0.0  ;;  %v606_v44 = vmul.f32 0.2, %v435_v39  ;;  %vm558_vm15 = vcmp.ge.f32.partialorder %v475_v40, 0.0  ;;  %v622_v45 = vmul.f32 0.2, %v475_v40 }
  0xc1   :  { %v575_v58 = vmul.f32 0.2, %v358_v52  ;;  %v591_v59 = vmul.f32 0.2, %v398_v53  ;;  %vm511_vm0 = vcmp.ge.f32.partialorder %v358_v52, 0.0  ;;  %vm527_vm1 = vcmp.ge.f32.partialorder %v398_v53, 0.0 }
  0xc2   :  { %v670_v48 = vsel %vm542_vm14, %v435_v39, %v606_v44  ;;  %v686_v49 = vsel %vm558_vm15, %v475_v40, %v622_v45 }
  0xc3   :  { %v1119_v50 = vpack.c.bf16 %v670_v48, %v669_v46  ;;  %v1159_v51 = vpack.c.bf16 %v686_v49, %v685_v47  ;;  %v639_v2 = vsel %vm511_vm0, %v358_v52, %v575_v58  ;;  %v655_v3 = vsel %vm527_vm1, %v398_v53, %v591_v59 }
  0xc5   :  { %1207 = vst [vmem:[%s1555_s3 + $0x88] sm:$0xff] %v1119_v50   ;;  %v437_v54 = vpop.f32.mrf.mxu2  ;;  %v477_v55 = vpop.f32.mrf.mxu3 }
  0xc6   :  { %1215 = vst [vmem:[%s1555_s3 + $0xc8] sm:$0xff] %v1159_v51   ;;  %v359_v56 = vpop.f32.mrf.mxu0  ;;  %v399_v57 = vpop.f32.mrf.mxu1  ;;  %v438_v0 = vadd.f32 %v1390_v42, %v437_v54  ;;  %v478_v1 = vadd.f32 %v1390_v42, %v477_v55 }
  0xc7   :  { %v360_v60 = vadd.f32 %v1390_v42, %v359_v56  ;;  %v400_v61 = vadd.f32 %v1390_v42, %v399_v57 }
  0xc8   :  { %v607_v10 = vmul.f32 0.2, %v438_v0  ;;  %v623_v11 = vmul.f32 0.2, %v478_v1  ;;  %vm543_vm4 = vcmp.ge.f32.partialorder %v438_v0, 0.0  ;;  %vm559_vm5 = vcmp.ge.f32.partialorder %v478_v1, 0.0 }
  0xc9   :  { %vm512_vm2 = vcmp.ge.f32.partialorder %v360_v60, 0.0  ;;  %v576_v62 = vmul.f32 0.2, %v360_v60  ;;  %vm528_vm3 = vcmp.ge.f32.partialorder %v400_v61, 0.0  ;;  %v592_v63 = vmul.f32 0.2, %v400_v61 }
  0xca   :  { %v671_v18 = vsel %vm543_vm4, %v438_v0, %v607_v10  ;;  %v687_v19 = vsel %vm559_vm5, %v478_v1, %v623_v11 }
  0xcb   :  { %v640_v4 = vsel %vm512_vm2, %v360_v60, %v576_v62  ;;  %v656_v5 = vsel %vm528_vm3, %v400_v61, %v592_v63 }
  0xcc   :  { %v1044_v6 = vpack.c.bf16 %v640_v4, %v639_v2  ;;  %v1084_v7 = vpack.c.bf16 %v656_v5, %v655_v3 }
  0xcd   :  { %v439_v8 = vpop.f32.mrf.mxu2  ;;  %v479_v9 = vpop.f32.mrf.mxu3 }
  0xce   :  { %1192 = vst [vmem:[%s1555_s3 + $0x10] sm:$0xff] %v1044_v6   ;;  %v440_v12 = vadd.f32 %v1390_v42, %v439_v8  ;;  %v480_v13 = vadd.f32 %v1390_v42, %v479_v9  ;;  %v362_v14 = vpop.f32.mrf.mxu0  ;;  %v402_v15 = vpop.f32.mrf.mxu1 }
  0xcf   :  { %1200 = vst [vmem:[%s1555_s3 + $0x50] sm:$0xff] %v1084_v7   ;;  %v363_v24 = vadd.f32 %v1390_v42, %v362_v14  ;;  %v403_v25 = vadd.f32 %v1390_v42, %v402_v15 }
  0xd0   :  { %vm544_vm6 = vcmp.ge.f32.partialorder %v440_v12, 0.0  ;;  %v608_v16 = vmul.f32 0.2, %v440_v12  ;;  %vm560_vm7 = vcmp.ge.f32.partialorder %v480_v13, 0.0  ;;  %v624_v17 = vmul.f32 0.2, %v480_v13 }
  0xd1   :  { %v577_v30 = vmul.f32 0.2, %v363_v24  ;;  %v593_v31 = vmul.f32 0.2, %v403_v25  ;;  %vm513_vm8 = vcmp.ge.f32.partialorder %v363_v24, 0.0  ;;  %vm529_vm9 = vcmp.ge.f32.partialorder %v403_v25, 0.0 }
  0xd2   :  { %v672_v20 = vsel %vm544_vm6, %v440_v12, %v608_v16  ;;  %v688_v21 = vsel %vm560_vm7, %v480_v13, %v624_v17 }
  0xd3   :  { %v1124_v22 = vpack.c.bf16 %v672_v20, %v671_v18  ;;  %v1164_v23 = vpack.c.bf16 %v688_v21, %v687_v19  ;;  %v641_v38 = vsel %vm513_vm8, %v363_v24, %v577_v30  ;;  %v657_v39 = vsel %vm529_vm9, %v403_v25, %v593_v31 }
  0xd5   :  { %1208 = vst [vmem:[%s1555_s3 + $0x90] sm:$0xff] %v1124_v22   ;;  %v442_v26 = vpop.f32.mrf.mxu2  ;;  %v482_v27 = vpop.f32.mrf.mxu3 }
  0xd6   :  { %1216 = vst [vmem:[%s1555_s3 + $0xd0] sm:$0xff] %v1164_v23   ;;  %v364_v28 = vpop.f32.mrf.mxu0  ;;  %v404_v29 = vpop.f32.mrf.mxu1  ;;  %v443_v36 = vadd.f32 %v1390_v42, %v442_v26  ;;  %v483_v37 = vadd.f32 %v1390_v42, %v482_v27 }
  0xd7   :  { %v365_v32 = vadd.f32 %v1390_v42, %v364_v28  ;;  %v405_v33 = vadd.f32 %v1390_v42, %v404_v29 }
  0xd8   :  { %v609_v47 = vmul.f32 0.2, %v443_v36  ;;  %v625_v48 = vmul.f32 0.2, %v483_v37  ;;  %vm545_vm12 = vcmp.ge.f32.partialorder %v443_v36, 0.0  ;;  %vm561_vm13 = vcmp.ge.f32.partialorder %v483_v37, 0.0 }
  0xd9   :  { %vm514_vm10 = vcmp.ge.f32.partialorder %v365_v32, 0.0  ;;  %v578_v34 = vmul.f32 0.2, %v365_v32  ;;  %vm530_vm11 = vcmp.ge.f32.partialorder %v405_v33, 0.0  ;;  %v594_v35 = vmul.f32 0.2, %v405_v33 }
  0xda   :  { %v673_v55 = vsel %vm545_vm12, %v443_v36, %v609_v47  ;;  %v689_v56 = vsel %vm561_vm13, %v483_v37, %v625_v48 }
  0xdb   :  { %v642_v40 = vsel %vm514_vm10, %v365_v32, %v578_v34  ;;  %v658_v41 = vsel %vm530_vm11, %v405_v33, %v594_v35 }
  0xdc   :  { %v1049_v43 = vpack.c.bf16 %v642_v40, %v641_v38  ;;  %v1089_v44 = vpack.c.bf16 %v658_v41, %v657_v39 }
  0xdd   :  { %v444_v45 = vpop.f32.mrf.mxu2  ;;  %v484_v46 = vpop.f32.mrf.mxu3 }
  0xde   :  { %1193 = vst [vmem:[%s1555_s3 + $0x18] sm:$0xff] %v1049_v43   ;;  %v445_v49 = vadd.f32 %v1390_v42, %v444_v45  ;;  %v485_v50 = vadd.f32 %v1390_v42, %v484_v46  ;;  %v367_v51 = vpop.f32.mrf.mxu0  ;;  %v407_v52 = vpop.f32.mrf.mxu1 }
  0xdf   :  { %1201 = vst [vmem:[%s1555_s3 + $0x58] sm:$0xff] %v1089_v44   ;;  %v368_v61 = vadd.f32 %v1390_v42, %v367_v51  ;;  %v408_v62 = vadd.f32 %v1390_v42, %v407_v52 }
  0xe0   :  { %vm546_vm14 = vcmp.ge.f32.partialorder %v445_v49, 0.0  ;;  %v610_v53 = vmul.f32 0.2, %v445_v49  ;;  %vm562_vm15 = vcmp.ge.f32.partialorder %v485_v50, 0.0  ;;  %v626_v54 = vmul.f32 0.2, %v485_v50 }
  0xe1   :  { %v579_v3 = vmul.f32 0.2, %v368_v61  ;;  %v595_v4 = vmul.f32 0.2, %v408_v62  ;;  %vm515_vm0 = vcmp.ge.f32.partialorder %v368_v61, 0.0  ;;  %vm531_vm1 = vcmp.ge.f32.partialorder %v408_v62, 0.0 }
  0xe2   :  { %v674_v57 = vsel %vm546_vm14, %v445_v49, %v610_v53  ;;  %v690_v58 = vsel %vm562_vm15, %v485_v50, %v626_v54 }
  0xe3   :  { %v1129_v59 = vpack.c.bf16 %v674_v57, %v673_v55  ;;  %v1169_v60 = vpack.c.bf16 %v690_v58, %v689_v56  ;;  %v643_v11 = vsel %vm515_vm0, %v368_v61, %v579_v3  ;;  %v659_v12 = vsel %vm531_vm1, %v408_v62, %v595_v4 }
  0xe5   :  { %1209 = vst [vmem:[%s1555_s3 + $0x98] sm:$0xff] %v1129_v59   ;;  %v447_v63 = vpop.f32.mrf.mxu2  ;;  %v487_v0 = vpop.f32.mrf.mxu3 }
  0xe6   :  { %1217 = vst [vmem:[%s1555_s3 + $0xd8] sm:$0xff] %v1169_v60   ;;  %v369_v1 = vpop.f32.mrf.mxu0  ;;  %v409_v2 = vpop.f32.mrf.mxu1  ;;  %v448_v9 = vadd.f32 %v1390_v42, %v447_v63  ;;  %v488_v10 = vadd.f32 %v1390_v42, %v487_v0 }
  0xe7   :  { %v370_v5 = vadd.f32 %v1390_v42, %v369_v1  ;;  %v410_v6 = vadd.f32 %v1390_v42, %v409_v2 }
  0xe8   :  { %v611_v19 = vmul.f32 0.2, %v448_v9  ;;  %v627_v20 = vmul.f32 0.2, %v488_v10  ;;  %vm547_vm4 = vcmp.ge.f32.partialorder %v448_v9, 0.0  ;;  %vm563_vm5 = vcmp.ge.f32.partialorder %v488_v10, 0.0 }
  0xe9   :  { %vm516_vm2 = vcmp.ge.f32.partialorder %v370_v5, 0.0  ;;  %v580_v7 = vmul.f32 0.2, %v370_v5  ;;  %vm532_vm3 = vcmp.ge.f32.partialorder %v410_v6, 0.0  ;;  %v596_v8 = vmul.f32 0.2, %v410_v6 }
  0xea   :  { %v675_v27 = vsel %vm547_vm4, %v448_v9, %v611_v19  ;;  %v691_v28 = vsel %vm563_vm5, %v488_v10, %v627_v20 }
  0xeb   :  { %v644_v13 = vsel %vm516_vm2, %v370_v5, %v580_v7  ;;  %v660_v14 = vsel %vm532_vm3, %v410_v6, %v596_v8 }
  0xec   :  { %v1054_v15 = vpack.c.bf16 %v644_v13, %v643_v11  ;;  %v1094_v16 = vpack.c.bf16 %v660_v14, %v659_v12 }
  0xed   :  { %v449_v17 = vpop.f32.mrf.mxu2  ;;  %v489_v18 = vpop.f32.mrf.mxu3 }
  0xee   :  { %1194 = vst [vmem:[%s1555_s3 + $0x20] sm:$0xff] %v1054_v15   ;;  %v450_v21 = vadd.f32 %v1390_v42, %v449_v17  ;;  %v490_v22 = vadd.f32 %v1390_v42, %v489_v18  ;;  %v372_v23 = vpop.f32.mrf.mxu0  ;;  %v412_v24 = vpop.f32.mrf.mxu1 }
  0xef   :  { %1202 = vst [vmem:[%s1555_s3 + $0x60] sm:$0xff] %v1094_v16   ;;  %v373_v33 = vadd.f32 %v1390_v42, %v372_v23  ;;  %v413_v34 = vadd.f32 %v1390_v42, %v412_v24 }
  0xf0   :  { %vm548_vm6 = vcmp.ge.f32.partialorder %v450_v21, 0.0  ;;  %v612_v25 = vmul.f32 0.2, %v450_v21  ;;  %vm564_vm7 = vcmp.ge.f32.partialorder %v490_v22, 0.0  ;;  %v628_v26 = vmul.f32 0.2, %v490_v22 }
  0xf1   :  { %v581_v39 = vmul.f32 0.2, %v373_v33  ;;  %v597_v40 = vmul.f32 0.2, %v413_v34  ;;  %vm517_vm8 = vcmp.ge.f32.partialorder %v373_v33, 0.0  ;;  %vm533_vm9 = vcmp.ge.f32.partialorder %v413_v34, 0.0 }
  0xf2   :  { %v676_v29 = vsel %vm548_vm6, %v450_v21, %v612_v25  ;;  %v692_v30 = vsel %vm564_vm7, %v490_v22, %v628_v26 }
  0xf3   :  { %v1134_v31 = vpack.c.bf16 %v676_v29, %v675_v27  ;;  %v1174_v32 = vpack.c.bf16 %v692_v30, %v691_v28  ;;  %v645_v48 = vsel %vm517_vm8, %v373_v33, %v581_v39  ;;  %v661_v49 = vsel %vm533_vm9, %v413_v34, %v597_v40 }
  0xf5   :  { %1210 = vst [vmem:[%s1555_s3 + $0xa0] sm:$0xff] %v1134_v31   ;;  %v452_v35 = vpop.f32.mrf.mxu2  ;;  %v492_v36 = vpop.f32.mrf.mxu3 }
  0xf6   :  { %1218 = vst [vmem:[%s1555_s3 + $0xe0] sm:$0xff] %v1174_v32   ;;  %v374_v37 = vpop.f32.mrf.mxu0  ;;  %v414_v38 = vpop.f32.mrf.mxu1  ;;  %v453_v46 = vadd.f32 %v1390_v42, %v452_v35  ;;  %v493_v47 = vadd.f32 %v1390_v42, %v492_v36 }
  0xf7   :  { %v375_v41 = vadd.f32 %v1390_v42, %v374_v37  ;;  %v415_v43 = vadd.f32 %v1390_v42, %v414_v38 }
  0xf8   :  { %v613_v56 = vmul.f32 0.2, %v453_v46  ;;  %v629_v57 = vmul.f32 0.2, %v493_v47  ;;  %vm549_vm12 = vcmp.ge.f32.partialorder %v453_v46, 0.0  ;;  %vm565_vm13 = vcmp.ge.f32.partialorder %v493_v47, 0.0 }
  0xf9   :  { %vm518_vm10 = vcmp.ge.f32.partialorder %v375_v41, 0.0  ;;  %v582_v44 = vmul.f32 0.2, %v375_v41  ;;  %vm534_vm11 = vcmp.ge.f32.partialorder %v415_v43, 0.0  ;;  %v598_v45 = vmul.f32 0.2, %v415_v43 }
  0xfa   :  { %v677_v0 = vsel %vm549_vm12, %v453_v46, %v613_v56  ;;  %v693_v1 = vsel %vm565_vm13, %v493_v47, %v629_v57 }
  0xfb   :  { %v646_v50 = vsel %vm518_vm10, %v375_v41, %v582_v44  ;;  %v662_v51 = vsel %vm534_vm11, %v415_v43, %v598_v45 }
  0xfc   :  { %v1059_v52 = vpack.c.bf16 %v646_v50, %v645_v48  ;;  %v1099_v53 = vpack.c.bf16 %v662_v51, %v661_v49 }
  0xfd   :  { %v454_v54 = vpop.f32.mrf.mxu2  ;;  %v494_v55 = vpop.f32.mrf.mxu3 }
  0xfe   :  { %1195 = vst [vmem:[%s1555_s3 + $0x28] sm:$0xff] %v1059_v52   ;;  %v455_v58 = vadd.f32 %v1390_v42, %v454_v54  ;;  %v495_v59 = vadd.f32 %v1390_v42, %v494_v55  ;;  %v377_v60 = vpop.f32.mrf.mxu0  ;;  %v417_v61 = vpop.f32.mrf.mxu1 }
  0xff   :  { %1203 = vst [vmem:[%s1555_s3 + $0x68] sm:$0xff] %v1099_v53   ;;  %v378_v6 = vadd.f32 %v1390_v42, %v377_v60  ;;  %v418_v7 = vadd.f32 %v1390_v42, %v417_v61 }
 0x100   :  { %vm550_vm14 = vcmp.ge.f32.partialorder %v455_v58, 0.0  ;;  %v614_v62 = vmul.f32 0.2, %v455_v58  ;;  %vm566_vm15 = vcmp.ge.f32.partialorder %v495_v59, 0.0  ;;  %v630_v63 = vmul.f32 0.2, %v495_v59 }
 0x101   :  { %v583_v12 = vmul.f32 0.2, %v378_v6  ;;  %v599_v13 = vmul.f32 0.2, %v418_v7  ;;  %vm519_vm0 = vcmp.ge.f32.partialorder %v378_v6, 0.0  ;;  %vm535_vm1 = vcmp.ge.f32.partialorder %v418_v7, 0.0 }
 0x102   :  { %v678_v2 = vsel %vm550_vm14, %v455_v58, %v614_v62  ;;  %v694_v3 = vsel %vm566_vm15, %v495_v59, %v630_v63 }
 0x103   :  { %v1139_v4 = vpack.c.bf16 %v678_v2, %v677_v0  ;;  %v1179_v5 = vpack.c.bf16 %v694_v3, %v693_v1  ;;  %v647_v20 = vsel %vm519_vm0, %v378_v6, %v583_v12  ;;  %v663_v21 = vsel %vm535_vm1, %v418_v7, %v599_v13 }
 0x105   :  { %1211 = vst [vmem:[%s1555_s3 + $0xa8] sm:$0xff] %v1139_v4   ;;  %v457_v8 = vpop.f32.mrf.mxu2  ;;  %v497_v9 = vpop.f32.mrf.mxu3 }
 0x106   :  { %1219 = vst [vmem:[%s1555_s3 + $0xe8] sm:$0xff] %v1179_v5   ;;  %v379_v10 = vpop.f32.mrf.mxu0  ;;  %v419_v11 = vpop.f32.mrf.mxu1  ;;  %v458_v18 = vadd.f32 %v1390_v42, %v457_v8  ;;  %v498_v19 = vadd.f32 %v1390_v42, %v497_v9 }
 0x107   :  { %v380_v14 = vadd.f32 %v1390_v42, %v379_v10  ;;  %v420_v15 = vadd.f32 %v1390_v42, %v419_v11 }
 0x108   :  { %v615_v28 = vmul.f32 0.2, %v458_v18  ;;  %v631_v29 = vmul.f32 0.2, %v498_v19  ;;  %vm551_vm4 = vcmp.ge.f32.partialorder %v458_v18, 0.0  ;;  %vm567_vm5 = vcmp.ge.f32.partialorder %v498_v19, 0.0 }
 0x109   :  { %vm520_vm2 = vcmp.ge.f32.partialorder %v380_v14, 0.0  ;;  %v584_v16 = vmul.f32 0.2, %v380_v14  ;;  %vm536_vm3 = vcmp.ge.f32.partialorder %v420_v15, 0.0  ;;  %v600_v17 = vmul.f32 0.2, %v420_v15 }
 0x10a   :  { %v679_v36 = vsel %vm551_vm4, %v458_v18, %v615_v28  ;;  %v695_v37 = vsel %vm567_vm5, %v498_v19, %v631_v29 }
 0x10b   :  { %v648_v22 = vsel %vm520_vm2, %v380_v14, %v584_v16  ;;  %v664_v23 = vsel %vm536_vm3, %v420_v15, %v600_v17 }
 0x10c   :  { %v1064_v24 = vpack.c.bf16 %v648_v22, %v647_v20  ;;  %v1104_v25 = vpack.c.bf16 %v664_v23, %v663_v21 }
 0x10d   :  { %v459_v26 = vpop.f32.mrf.mxu2  ;;  %v499_v27 = vpop.f32.mrf.mxu3 }
 0x10e   :  { %1196 = vst [vmem:[%s1555_s3 + $0x30] sm:$0xff] %v1064_v24   ;;  %v460_v30 = vadd.f32 %v1390_v42, %v459_v26  ;;  %v500_v31 = vadd.f32 %v1390_v42, %v499_v27  ;;  %v382_v32 = vpop.f32.mrf.mxu0  ;;  %v422_v33 = vpop.f32.mrf.mxu1 }
 0x10f   :  { %1204 = vst [vmem:[%s1555_s3 + $0x70] sm:$0xff] %v1104_v25   ;;  %v383_v43 = vadd.f32 %v1390_v42, %v382_v32  ;;  %v423_v44 = vadd.f32 %v1390_v42, %v422_v33 }
 0x110   :  { %vm552_vm6 = vcmp.ge.f32.partialorder %v460_v30, 0.0  ;;  %v616_v34 = vmul.f32 0.2, %v460_v30  ;;  %vm568_vm7 = vcmp.ge.f32.partialorder %v500_v31, 0.0  ;;  %v632_v35 = vmul.f32 0.2, %v500_v31 }
 0x111   :  { %v585_v49 = vmul.f32 0.2, %v383_v43  ;;  %v601_v50 = vmul.f32 0.2, %v423_v44  ;;  %vm521_vm8 = vcmp.ge.f32.partialorder %v383_v43, 0.0  ;;  %vm537_vm9 = vcmp.ge.f32.partialorder %v423_v44, 0.0 }
 0x112   :  { %v680_v38 = vsel %vm552_vm6, %v460_v30, %v616_v34  ;;  %v696_v39 = vsel %vm568_vm7, %v500_v31, %v632_v35 }
 0x113   :  { %v1144_v40 = vpack.c.bf16 %v680_v38, %v679_v36  ;;  %v1184_v41 = vpack.c.bf16 %v696_v39, %v695_v37  ;;  %v649_v57 = vsel %vm521_vm8, %v383_v43, %v585_v49  ;;  %v665_v58 = vsel %vm537_vm9, %v423_v44, %v601_v50 }
 0x115   :  { %1212 = vst [vmem:[%s1555_s3 + $0xb0] sm:$0xff] %v1144_v40   ;;  %v462_v45 = vpop.f32.mrf.mxu2  ;;  %v502_v46 = vpop.f32.mrf.mxu3 }
 0x116   :  { %1220 = vst [vmem:[%s1555_s3 + $0xf0] sm:$0xff] %v1184_v41   ;;  %v384_v47 = vpop.f32.mrf.mxu0  ;;  %v424_v48 = vpop.f32.mrf.mxu1  ;;  %v463_v55 = vadd.f32 %v1390_v42, %v462_v45  ;;  %v503_v56 = vadd.f32 %v1390_v42, %v502_v46 }
 0x117   :  { %v385_v51 = vadd.f32 %v1390_v42, %v384_v47  ;;  %v425_v52 = vadd.f32 %v1390_v42, %v424_v48 }
 0x118   :  { %v617_v1 = vmul.f32 0.2, %v463_v55  ;;  %v633_v2 = vmul.f32 0.2, %v503_v56  ;;  %vm553_vm12 = vcmp.ge.f32.partialorder %v463_v55, 0.0  ;;  %vm569_vm13 = vcmp.ge.f32.partialorder %v503_v56, 0.0 }
 0x119   :  { %vm522_vm10 = vcmp.ge.f32.partialorder %v385_v51, 0.0  ;;  %v586_v53 = vmul.f32 0.2, %v385_v51  ;;  %vm538_vm11 = vcmp.ge.f32.partialorder %v425_v52, 0.0  ;;  %v602_v54 = vmul.f32 0.2, %v425_v52 }
 0x11a   :  { %v681_v7 = vsel %vm553_vm12, %v463_v55, %v617_v1  ;;  %v697_v8 = vsel %vm569_vm13, %v503_v56, %v633_v2 }
 0x11b   :  { %v650_v59 = vsel %vm522_vm10, %v385_v51, %v586_v53  ;;  %v666_v60 = vsel %vm538_vm11, %v425_v52, %v602_v54 }
 0x11c   :  { %v1069_v61 = vpack.c.bf16 %v650_v59, %v649_v57  ;;  %v1109_v62 = vpack.c.bf16 %v666_v60, %v665_v58 }
 0x11d   :  { %v464_v63 = vpop.f32.mrf.mxu2  ;;  %v504_v0 = vpop.f32.mrf.mxu3 }
 0x11e   :  { %1197 = vst [vmem:[%s1555_s3 + $0x38] sm:$0xff] %v1069_v61   ;;  %v465_v3 = vadd.f32 %v1390_v42, %v464_v63  ;;  %v505_v4 = vadd.f32 %v1390_v42, %v504_v0 }
 0x11f   :  { %1205 = vst [vmem:[%s1555_s3 + $0x78] sm:$0xff] %v1109_v62  }
 0x120   :  { %vm554_vm14 = vcmp.ge.f32.partialorder %v465_v3, 0.0  ;;  %v618_v5 = vmul.f32 0.2, %v465_v3  ;;  %vm570_vm15 = vcmp.ge.f32.partialorder %v505_v4, 0.0  ;;  %v634_v6 = vmul.f32 0.2, %v505_v4 }
 0x122   :  { %v682_v9 = vsel %vm554_vm14, %v465_v3, %v618_v5  ;;  %v698_v10 = vsel %vm570_vm15, %v505_v4, %v634_v6 }
 0x123   :  { %v1149_v11 = vpack.c.bf16 %v682_v9, %v681_v7  ;;  %v1189_v12 = vpack.c.bf16 %v698_v10, %v697_v8 }
 0x125   :  { %1213 = vst [vmem:[%s1555_s3 + $0xb8] sm:$0xff] %v1149_v11  }
 0x126   :  { %1221 = vst [vmem:[%s1555_s3 + $0xf8] sm:$0xff] %v1189_v12  }

// kernel: discriminator_forward.6
= control target key start
LH: loop header
LB: loop body
LE: loop exit
PB: predicated region body
PF: predicated region fallthrough
CT: control target
= control target key end

     0   :  { %s795_s1 = inlined_call_operand.vmem [shape: bf16[128,128], index: 1, kind: input, shape index: {}]   ;;  %s796_s0 = inlined_call_operand.vmem [shape: bf16[128,128], index: 0, kind: input, shape index: {}]   ;;  %s797_s3 = inlined_call_operand.vmem [shape: f32[1,128], index: 3, kind: input, shape index: {}]   ;;  %s798_s2 = inlined_call_operand.vmem [shape: f32[1,128], index: 2, kind: input, shape index: {}]   ;;  %s799_s4 = inlined_call_operand.vmem [shape: bf16[128,128], index: 4, kind: output, shape index: {}]  }
   0x1   :  { %v487_v0 = vld [vmem:[%s795_s1 + $0x38] sm:$0xff]  ;;  %v486_v1 = vld [vmem:[%s795_s1 + $0x30] sm:$0xff]  ;;  %v485_v2 = vld [vmem:[%s795_s1 + $0x28] sm:$0xff] }
   0x2   :  { %145 = vmatpush.bf16.msra.mxu0 %v487_v0  ;;  %535 = vmatpush.bf16.msra.mxu1 %v487_v0  ;;  %v484_v3 = vld [vmem:[%s795_s1 + $0x20] sm:$0xff]  ;;  %v483_v4 = vld [vmem:[%s795_s1 + $0x18] sm:$0xff]  ;;  %v482_v5 = vld [vmem:[%s795_s1 + $0x10] sm:$0xff] }
   0x3   :  { %536 = vmatpush.bf16.msra.mxu2 %v487_v0  ;;  %537 = vmatpush.bf16.msra.mxu3 %v487_v0  ;;  %v481_v6 = vld [vmem:[%s795_s1 + $0x8] sm:$0xff]  ;;  %v480_v7 = vld [vmem:[%s795_s1] sm:$0xff]  ;;  %v474_v9 = vld [vmem:[%s796_s0 + $0x10] sm:$0xff] }
   0x4   :  { %v472_v8 = vld [vmem:[%s796_s0] sm:$0xff]  ;;  %v478_v11 = vld [vmem:[%s796_s0 + $0x30] sm:$0xff]  ;;  %v473_v12 = vld [vmem:[%s796_s0 + $0x8] sm:$0xff] }
   0x5   :  { %v476_v10 = vld [vmem:[%s796_s0 + $0x20] sm:$0xff]  ;;  %v475_v13 = vld [vmem:[%s796_s0 + $0x18] sm:$0xff]  ;;  %v477_v14 = vld [vmem:[%s796_s0 + $0x28] sm:$0xff] }
   0x6   :  { %146 = vmatpush.bf16.msra.mxu0 %v486_v1  ;;  %538 = vmatpush.bf16.msra.mxu1 %v486_v1  ;;  %v479_v15 = vld [vmem:[%s796_s0 + $0x38] sm:$0xff] }
   0x7   :  { %539 = vmatpush.bf16.msra.mxu2 %v486_v1  ;;  %540 = vmatpush.bf16.msra.mxu3 %v486_v1 }
   0xa   :  { %147 = vmatpush.bf16.msra.mxu0 %v485_v2  ;;  %541 = vmatpush.bf16.msra.mxu1 %v485_v2 }
   0xb   :  { %542 = vmatpush.bf16.msra.mxu2 %v485_v2  ;;  %543 = vmatpush.bf16.msra.mxu3 %v485_v2 }
   0xe   :  { %148 = vmatpush.bf16.msra.mxu0 %v484_v3  ;;  %544 = vmatpush.bf16.msra.mxu1 %v484_v3 }
   0xf   :  { %545 = vmatpush.bf16.msra.mxu2 %v484_v3  ;;  %546 = vmatpush.bf16.msra.mxu3 %v484_v3 }
  0x12   :  { %149 = vmatpush.bf16.msra.mxu0 %v483_v4  ;;  %547 = vmatpush.bf16.msra.mxu1 %v483_v4 }
  0x13   :  { %548 = vmatpush.bf16.msra.mxu2 %v483_v4  ;;  %549 = vmatpush.bf16.msra.mxu3 %v483_v4 }
  0x16   :  { %150 = vmatpush.bf16.msra.mxu0 %v482_v5  ;;  %550 = vmatpush.bf16.msra.mxu1 %v482_v5 }
  0x17   :  { %551 = vmatpush.bf16.msra.mxu2 %v482_v5  ;;  %552 = vmatpush.bf16.msra.mxu3 %v482_v5 }
  0x1a   :  { %151 = vmatpush.bf16.msra.mxu0 %v481_v6  ;;  %553 = vmatpush.bf16.msra.mxu1 %v481_v6 }
  0x1b   :  { %554 = vmatpush.bf16.msra.mxu2 %v481_v6  ;;  %555 = vmatpush.bf16.msra.mxu3 %v481_v6 }
  0x1e   :  { %152 = vmatpush.bf16.msra.mxu0 %v480_v7  ;;  %556 = vmatpush.bf16.msra.mxu1 %v480_v7 }
  0x1f   :  { %557 = vmatpush.bf16.msra.mxu2 %v480_v7  ;;  %558 = vmatpush.bf16.msra.mxu3 %v480_v7 }
  0x21   :  { %153 = vmatmul.bf16.vlgmr.msra.gmra.mxu0 %v472_v8  ;;  %163 = vmatmul.bf16.vlgmr.msra.gmra.mxu1 %v474_v9 }
  0x22   :  { %173 = vmatmul.bf16.vlgmr.msra.gmra.mxu2 %v476_v10  ;;  %183 = vmatmul.bf16.vlgmr.msra.gmra.mxu3 %v478_v11 }
  0x31   :  { %158 = vmatmul.bf16.gmra.mxu0 %v473_v12  ;;  %168 = vmatmul.bf16.gmra.mxu1 %v475_v13 }
  0x32   :  { %178 = vmatmul.bf16.gmra.mxu2 %v477_v14  ;;  %188 = vmatmul.bf16.gmra.mxu3 %v479_v15 }
  0x9e   :  { %v635_v16 = vpop.f32.mrf.mxu0  ;;  %v637_v17 = vpop.f32.mrf.mxu1 }
  0x9f   :  { %v216_v26 = vmul.f32 %v635_v16, %v635_v16  ;;  %v220_v36 = vmul.f32 %v637_v17, %v637_v17 }
  0xa5   :  { %v641_v19 = vpop.f32.mrf.mxu2  ;;  %v647_v22 = vpop.f32.mrf.mxu3 }
  0xa6   :  { %v639_v18 = vpop.f32.mrf.mxu0  ;;  %v643_v20 = vpop.f32.mrf.mxu1  ;;  %v224_v50 = vmul.f32 %v641_v19, %v641_v19  ;;  %v228_v0 = vmul.f32 %v647_v22, %v647_v22 }
  0xa7   :  { %v217_v24 = vmul.f32 %v639_v18, %v639_v18  ;;  %v194_v27 = vadd.f32 %v639_v18, %v635_v16  ;;  %v221_v40 = vmul.f32 %v643_v20, %v643_v20 }
  0xa9   :  { %v232_v29 = vadd.f32 %v217_v24, %v216_v26 }
  0xad   :  { %v649_v23 = vpop.f32.mrf.mxu2  ;;  %v667_v35 = vpop.f32.mrf.mxu3 }
  0xae   :  { %v645_v21 = vpop.f32.mrf.mxu0  ;;  %v653_v25 = vpop.f32.mrf.mxu1  ;;  %v225_v54 = vmul.f32 %v649_v23, %v649_v23  ;;  %v229_v3 = vmul.f32 %v667_v35, %v667_v35 }
  0xaf   :  { %v218_v28 = vmul.f32 %v645_v21, %v645_v21  ;;  %v195_v30 = vadd.f32 %v194_v27, %v645_v21  ;;  %v222_v44 = vmul.f32 %v653_v25, %v653_v25 }
  0xb1   :  { %v233_v32 = vadd.f32 %v232_v29, %v218_v28 }
  0xb5   :  { %v672_v39 = vpop.f32.mrf.mxu2  ;;  %v688_v53 = vpop.f32.mrf.mxu3 }
  0xb6   :  { %v662_v31 = vpop.f32.mrf.mxu0  ;;  %v677_v43 = vpop.f32.mrf.mxu1  ;;  %v226_v59 = vmul.f32 %v672_v39, %v672_v39  ;;  %v230_v8 = vmul.f32 %v688_v53, %v688_v53 }
  0xb7   :  { %v196_v33 = vadd.f32 %v195_v30, %v662_v31  ;;  %v219_v34 = vmul.f32 %v662_v31, %v662_v31  ;;  %v223_v48 = vmul.f32 %v677_v43, %v677_v43 }
  0xb9   :  { %v197_v37 = vadd.f32 %v196_v33, %v637_v17  ;;  %v234_v38 = vadd.f32 %v233_v32, %v219_v34 }
  0xbb   :  { %v235_v41 = vadd.f32 %v234_v38, %v220_v36  ;;  %v198_v42 = vadd.f32 %v197_v37, %v643_v20 }
  0xbd   :  { %v199_v45 = vadd.f32 %v198_v42, %v653_v25  ;;  %v236_v46 = vadd.f32 %v235_v41, %v221_v40  ;;  %v693_v57 = vpop.f32.mrf.mxu2  ;;  %v707_v6 = vpop.f32.mrf.mxu3 }
  0xbe   :  { %v227_v63 = vmul.f32 %v693_v57, %v693_v57  ;;  %v231_v12 = vmul.f32 %v707_v6, %v707_v6 }
  0xbf   :  { %v200_v47 = vadd.f32 %v199_v45, %v677_v43  ;;  %v237_v49 = vadd.f32 %v236_v46, %v222_v44 }
  0xc1   :  { %v201_v51 = vadd.f32 %v200_v47, %v641_v19  ;;  %v238_v52 = vadd.f32 %v237_v49, %v223_v48  ;;  %v256_v49 = vld [vmem:[%s798_s2] sm:$0x1] }
  0xc3   :  { %v239_v55 = vadd.f32 %v238_v52, %v224_v50  ;;  %v202_v56 = vadd.f32 %v201_v51, %v649_v23 }
  0xc5   :  { %v203_v58 = vadd.f32 %v202_v56, %v672_v39  ;;  %v240_v60 = vadd.f32 %v239_v55, %v225_v54 }
  0xc7   :  { %v241_v61 = vadd.f32 %v240_v60, %v226_v59  ;;  %v204_v62 = vadd.f32 %v203_v58, %v693_v57 }
  0xc9   :  { %v205_v1 = vadd.f32 %v204_v62, %v647_v22  ;;  %v242_v2 = vadd.f32 %v241_v61, %v227_v63 }
  0xcb   :  { %v243_v4 = vadd.f32 %v242_v2, %v228_v0  ;;  %v206_v5 = vadd.f32 %v205_v1, %v667_v35 }
  0xcd   :  { %v207_v7 = vadd.f32 %v206_v5, %v688_v53  ;;  %v244_v9 = vadd.f32 %v243_v4, %v229_v3 }
  0xcf   :  { %v245_v10 = vadd.f32 %v244_v9, %v230_v8  ;;  %v208_v11 = vadd.f32 %v207_v7, %v707_v6 }
  0xd1   :  { %v209_v13 = vrot.slane %v208_v11, 4  ;;  %v246_v14 = vadd.f32 %v245_v10, %v231_v12 }
  0xd3   :  { %v210_v15 = vadd.f32 %v209_v13, %v208_v11  ;;  %v247_v24 = vrot.slane %v246_v14, 4 }
  0xd5   :  { %v211_v26 = vrot.slane %v210_v15, 2  ;;  %v248_v27 = vadd.f32 %v247_v24, %v246_v14 }
  0xd7   :  { %v212_v28 = vadd.f32 %v211_v26, %v210_v15  ;;  %v249_v29 = vrot.slane %v248_v27, 2 }
  0xd9   :  { %v213_v30 = vrot.slane %v212_v28, 1  ;;  %v250_v32 = vadd.f32 %v249_v29, %v248_v27 }
  0xdb   :  { %v214_v33 = vadd.f32 %v213_v30, %v212_v28  ;;  %v251_v34 = vrot.slane %v250_v32, 1 }
  0xdd   :  { %v715_v36 = vmul.f32 0.0078125, %v214_v33  ;;  %v252_v37 = vadd.f32 %v251_v34, %v250_v32 }
  0xdf   :  { %v253_v38 = vmul.f32 0.0078125, %v252_v37  ;;  %v254_v40 = vmul.f32 %v715_v36, %v715_v36  ;;  %v269_v54 = vsub.f32 %v635_v16, %v715_v36  ;;  %v270_v55 = vsub.f32 %v639_v18, %v715_v36 }
  0xe0   :  { %v271_v56 = vsub.f32 %v645_v21, %v715_v36  ;;  %v272_v58 = vsub.f32 %v662_v31, %v715_v36  ;;  %v273_v59 = vsub.f32 %v637_v17, %v715_v36  ;;  %v274_v60 = vsub.f32 %v643_v20, %v715_v36 }
  0xe1   :  { %v255_v41 = vsub.f32 %v253_v38, %v254_v40  ;;  %v275_v61 = vsub.f32 %v653_v25, %v715_v36  ;;  %v276_v16 = vsub.f32 %v677_v43, %v715_v36  ;;  %v277_v18 = vsub.f32 %v641_v19, %v715_v36  ;;  %v559_v19 = vld [vmem:[%s797_s3] ss:$0 sm:$0xff] }
  0xe2   :  { %v278_v21 = vsub.f32 %v649_v23, %v715_v36  ;;  %v279_v31 = vsub.f32 %v672_v39, %v715_v36  ;;  %v280_v17 = vsub.f32 %v693_v57, %v715_v36  ;;  %v281_v20 = vsub.f32 %v647_v22, %v715_v36 }
  0xe3   :  { %v257_v42 = vadd.f32 1e-05, %v255_v41  ;;  %v282_v25 = vsub.f32 %v667_v35, %v715_v36  ;;  %v283_v35 = vsub.f32 %v688_v53, %v715_v36  ;;  %v284_v9 = vsub.f32 %v707_v6, %v715_v36 }
  0xe5   :  { %560 = vrsqrt.f32 %v257_v42  ;;  %vm264_vm1 = vweird.f32 %v257_v42 }
  0xeb   :  { %v561_v44 = vpop.eup %560 }
  0xec   :  { %v259_v45 = vmul.f32 %v561_v44, %v257_v42  ;;  %vm265_vm0 = vweird.f32 %v561_v44 }
  0xed   :  { %vm266_vm2 = vmor %vm264_vm1, %vm265_vm0 }
  0xee   :  { %v260_v46 = vmul.f32 %v561_v44, %v259_v45 }
  0xf0   :  { %v261_v47 = vmul.f32 0.5, %v260_v46 }
  0xf2   :  { %v262_v48 = vsub.f32 1.5, %v261_v47 }
  0xf4   :  { %v263_v50 = vmul.f32 %v561_v44, %v262_v48 }
  0xf6   :  { %v267_v51 = vsel %vm266_vm2, %v561_v44, %v263_v50 }
  0xf7   :  { %v268_v52 = vmul.f32 %v267_v51, %v256_v49 }
  0xf9   :  { %v286_v62 = vperm.slane %v268_v52, 0 }
  0xfb   :  { %v288_v43 = vmul.f32 %v286_v62, %v269_v54  ;;  %v289_v63 = vmul.f32 %v286_v62, %v270_v55  ;;  %v290_v0 = vmul.f32 %v286_v62, %v271_v56  ;;  %v291_v23 = vmul.f32 %v286_v62, %v272_v58 }
  0xfc   :  { %v292_v1 = vmul.f32 %v286_v62, %v273_v59  ;;  %v293_v2 = vmul.f32 %v286_v62, %v274_v60  ;;  %v294_v39 = vmul.f32 %v286_v62, %v275_v61  ;;  %v295_v3 = vmul.f32 %v286_v62, %v276_v16 }
  0xfd   :  { %v296_v4 = vmul.f32 %v286_v62, %v277_v18  ;;  %v297_v57 = vmul.f32 %v286_v62, %v278_v21  ;;  %v298_v5 = vmul.f32 %v286_v62, %v279_v31  ;;  %v299_v7 = vmul.f32 %v286_v62, %v280_v17 }
  0xfe   :  { %v300_v22 = vmul.f32 %v286_v62, %v281_v20  ;;  %v301_v8 = vmul.f32 %v286_v62, %v282_v25  ;;  %v308_v10 = vadd.f32 %v559_v19, %v288_v43  ;;  %v309_v11 = vadd.f32 %v559_v19, %v289_v63 }
  0xff   :  { %v310_v12 = vadd.f32 %v559_v19, %v290_v0  ;;  %v311_v13 = vadd.f32 %v559_v19, %v291_v23  ;;  %v312_v14 = vadd.f32 %v559_v19, %v292_v1  ;;  %v313_v15 = vadd.f32 %v559_v19, %v293_v2 }
 0x100   :  { %v314_v24 = vadd.f32 %v559_v19, %v294_v39  ;;  %v315_v26 = vadd.f32 %v559_v19, %v295_v3  ;;  %v316_v27 = vadd.f32 %v559_v19, %v296_v4  ;;  %v317_v28 = vadd.f32 %v559_v19, %v297_v57 }
 0x101   :  { %v318_v29 = vadd.f32 %v559_v19, %v298_v5  ;;  %v319_v30 = vadd.f32 %v559_v19, %v299_v7  ;;  %v320_v32 = vadd.f32 %v559_v19, %v300_v22  ;;  %v321_v33 = vadd.f32 %v559_v19, %v301_v8 }
 0x102   :  { %v302_v34 = vmul.f32 %v286_v62, %v283_v35  ;;  %v303_v37 = vmul.f32 %v286_v62, %v284_v9  ;;  %vm324_vm3 = vcmp.ge.f32.partialorder %v308_v10, 0.0  ;;  %vm325_vm4 = vcmp.ge.f32.partialorder %v309_v11, 0.0 }
 0x103   :  { %vm326_vm5 = vcmp.ge.f32.partialorder %v310_v12, 0.0  ;;  %vm327_vm6 = vcmp.ge.f32.partialorder %v311_v13, 0.0  ;;  %vm328_vm7 = vcmp.ge.f32.partialorder %v312_v14, 0.0  ;;  %vm329_vm8 = vcmp.ge.f32.partialorder %v313_v15, 0.0 }
 0x104   :  { %vm330_vm9 = vcmp.ge.f32.partialorder %v314_v24, 0.0  ;;  %vm331_vm10 = vcmp.ge.f32.partialorder %v315_v26, 0.0  ;;  %vm332_vm11 = vcmp.ge.f32.partialorder %v316_v27, 0.0  ;;  %vm333_vm12 = vcmp.ge.f32.partialorder %v317_v28, 0.0 }
 0x105   :  { %vm334_vm13 = vcmp.ge.f32.partialorder %v318_v29, 0.0  ;;  %vm335_vm14 = vcmp.ge.f32.partialorder %v319_v30, 0.0  ;;  %vm336_vm15 = vcmp.ge.f32.partialorder %v320_v32, 0.0  ;;  %vm337_vm0 = vcmp.ge.f32.partialorder %v321_v33, 0.0 }
 0x106   :  { %v322_v53 = vadd.f32 %v559_v19, %v302_v34  ;;  %v340_v6 = vmul.f32 0.2, %v308_v10  ;;  %v341_v36 = vmul.f32 0.2, %v309_v11  ;;  %v342_v38 = vmul.f32 0.2, %v310_v12 }
 0x107   :  { %v323_v40 = vadd.f32 %v559_v19, %v303_v37  ;;  %v343_v41 = vmul.f32 0.2, %v311_v13  ;;  %v344_v42 = vmul.f32 0.2, %v312_v14  ;;  %v345_v44 = vmul.f32 0.2, %v313_v15 }
 0x108   :  { %v346_v45 = vmul.f32 0.2, %v314_v24  ;;  %v347_v46 = vmul.f32 0.2, %v315_v26  ;;  %v348_v47 = vmul.f32 0.2, %v316_v27  ;;  %v356_v48 = vsel %vm324_vm3, %v308_v10, %v340_v6 }
 0x109   :  { %v349_v49 = vmul.f32 0.2, %v317_v28  ;;  %v350_v50 = vmul.f32 0.2, %v318_v29  ;;  %v351_v51 = vmul.f32 0.2, %v319_v30  ;;  %v357_v52 = vsel %vm325_vm4, %v309_v11, %v341_v36 }
 0x10a   :  { %v352_v54 = vmul.f32 0.2, %v320_v32  ;;  %v353_v55 = vmul.f32 0.2, %v321_v33  ;;  %v354_v56 = vmul.f32 0.2, %v322_v53  ;;  %v358_v58 = vsel %vm326_vm5, %v310_v12, %v342_v38 }
 0x10b   :  { %v355_v59 = vmul.f32 0.2, %v323_v40  ;;  %v359_v60 = vsel %vm327_vm6, %v311_v13, %v343_v41  ;;  %v360_v61 = vsel %vm328_vm7, %v312_v14, %v344_v42  ;;  %v361_v16 = vsel %vm329_vm8, %v313_v15, %v345_v44 }
 0x10c   :  { %v362_v62 = vsel %vm330_vm9, %v314_v24, %v346_v45  ;;  %v363_v18 = vsel %vm331_vm10, %v315_v26, %v347_v46  ;;  %v364_v21 = vsel %vm332_vm11, %v316_v27, %v348_v47  ;;  %v365_v31 = vsel %vm333_vm12, %v317_v28, %v349_v49 }
 0x10d   :  { %vm338_vm1 = vcmp.ge.f32.partialorder %v322_v53, 0.0  ;;  %vm339_vm2 = vcmp.ge.f32.partialorder %v323_v40, 0.0  ;;  %v368_v17 = vsel %vm336_vm15, %v320_v32, %v352_v54  ;;  %v369_v20 = vsel %vm337_vm0, %v321_v33, %v353_v55 }
 0x10e   :  { %v366_v25 = vsel %vm334_vm13, %v318_v29, %v350_v50  ;;  %v367_v43 = vsel %vm335_vm14, %v319_v30, %v351_v51  ;;  %v491_v63 = vpack.c.bf16 %v357_v52, %v356_v48  ;;  %v496_v19 = vpack.c.bf16 %v359_v60, %v358_v58 }
 0x10f   :  { %v501_v0 = vpack.c.bf16 %v361_v16, %v360_v61  ;;  %v506_v23 = vpack.c.bf16 %v363_v18, %v362_v62  ;;  %v511_v1 = vpack.c.bf16 %v365_v31, %v364_v21  ;;  %v370_v2 = vsel %vm338_vm1, %v322_v53, %v354_v56 }
 0x110   :  { %v371_v39 = vsel %vm339_vm2, %v323_v40, %v355_v59  ;;  %492 = vst [vmem:[%s799_s4] sm:$0xff] %v491_v63   ;;  %v521_v3 = vpack.c.bf16 %v369_v20, %v368_v17  ;;  %v516_v4 = vpack.c.bf16 %v367_v43, %v366_v25 }
 0x111   :  { %528 = vst [vmem:[%s799_s4 + $0x8] sm:$0xff] %v496_v19   ;;  %v526_v57 = vpack.c.bf16 %v371_v39, %v370_v2 }
 0x112   :  { %529 = vst [vmem:[%s799_s4 + $0x10] sm:$0xff] %v501_v0  }
 0x113   :  { %530 = vst [vmem:[%s799_s4 + $0x18] sm:$0xff] %v506_v23  }
 0x114   :  { %531 = vst [vmem:[%s799_s4 + $0x20] sm:$0xff] %v511_v1  }
 0x115   :  { %532 = vst [vmem:[%s799_s4 + $0x28] sm:$0xff] %v516_v4  }
 0x116   :  { %533 = vst [vmem:[%s799_s4 + $0x30] sm:$0xff] %v521_v3  }
 0x117   :  { %534 = vst [vmem:[%s799_s4 + $0x38] sm:$0xff] %v526_v57  }

// kernel: discriminator_forward.7
= control target key start
LH: loop header
LB: loop body
LE: loop exit
PB: predicated region body
PF: predicated region fallthrough
CT: control target
= control target key end

     0   :  { %s337_s1 = inlined_call_operand.vmem [shape: bf16[128,128], index: 1, kind: input, shape index: {}]   ;;  %s338_s0 = inlined_call_operand.vmem [shape: bf16[32,128], index: 0, kind: input, shape index: {}]   ;;  %s339_s3 = inlined_call_operand.vmem [shape: f32[1,128], index: 3, kind: input, shape index: {}]   ;;  %s340_s2 = inlined_call_operand.vmem [shape: f32[1,128], index: 2, kind: input, shape index: {}]   ;;  %s341_s4 = inlined_call_operand.vmem [shape: bf16[32,128], index: 4, kind: output, shape index: {}]  }
   0x1   :  { %v247_v0 = vld [vmem:[%s337_s1 + $0x38] sm:$0xff]  ;;  %v246_v1 = vld [vmem:[%s337_s1 + $0x30] sm:$0xff]  ;;  %v245_v2 = vld [vmem:[%s337_s1 + $0x28] sm:$0xff] }
   0x2   :  { %97 = vmatpush.bf16.msra.mxu0 %v247_v0  ;;  %259 = vmatpush.bf16.msra.mxu1 %v247_v0  ;;  %v244_v3 = vld [vmem:[%s337_s1 + $0x20] sm:$0xff]  ;;  %v243_v4 = vld [vmem:[%s337_s1 + $0x18] sm:$0xff]  ;;  %v242_v5 = vld [vmem:[%s337_s1 + $0x10] sm:$0xff] }
   0x3   :  { %v241_v6 = vld [vmem:[%s337_s1 + $0x8] sm:$0xff]  ;;  %v240_v7 = vld [vmem:[%s337_s1] sm:$0xff] }
   0x4   :  { %v238_v8 = vld [vmem:[%s338_s0] sm:$0xff]  ;;  %v239_v9 = vld [vmem:[%s338_s0 + $0x8] sm:$0xff] }
   0x5   :  { %v142_v46 = vld [vmem:[%s340_s2] sm:$0x1] }
   0x6   :  { %98 = vmatpush.bf16.msra.mxu0 %v246_v1  ;;  %260 = vmatpush.bf16.msra.mxu1 %v246_v1  ;;  %v267_v55 = vld [vmem:[%s339_s3] ss:$0 sm:$0xff] }
   0xa   :  { %99 = vmatpush.bf16.msra.mxu0 %v245_v2  ;;  %261 = vmatpush.bf16.msra.mxu1 %v245_v2 }
   0xe   :  { %100 = vmatpush.bf16.msra.mxu0 %v244_v3  ;;  %262 = vmatpush.bf16.msra.mxu1 %v244_v3 }
  0x12   :  { %101 = vmatpush.bf16.msra.mxu0 %v243_v4  ;;  %263 = vmatpush.bf16.msra.mxu1 %v243_v4 }
  0x16   :  { %102 = vmatpush.bf16.msra.mxu0 %v242_v5  ;;  %264 = vmatpush.bf16.msra.mxu1 %v242_v5 }
  0x1a   :  { %103 = vmatpush.bf16.msra.mxu0 %v241_v6  ;;  %265 = vmatpush.bf16.msra.mxu1 %v241_v6 }
  0x1e   :  { %104 = vmatpush.bf16.msra.mxu0 %v240_v7  ;;  %266 = vmatpush.bf16.msra.mxu1 %v240_v7 }
  0x21   :  { %105 = vmatmul.bf16.vlgmr.msra.gmra.mxu0 %v238_v8  ;;  %110 = vmatmul.bf16.vlgmr.msra.gmra.mxu1 %v239_v9 }
  0x9e   :  { %v106_v10 = vpop.f32.mrf.mxu0  ;;  %v111_v11 = vpop.f32.mrf.mxu1 }
  0x9f   :  { %v126_v13 = vmul.f32 %v106_v10, %v106_v10  ;;  %v128_v17 = vmul.f32 %v111_v11, %v111_v11 }
  0xa6   :  { %v108_v12 = vpop.f32.mrf.mxu0  ;;  %v113_v16 = vpop.f32.mrf.mxu1 }
  0xa7   :  { %v116_v14 = vadd.f32 %v108_v12, %v106_v10  ;;  %v127_v15 = vmul.f32 %v108_v12, %v108_v12  ;;  %v129_v21 = vmul.f32 %v113_v16, %v113_v16 }
  0xa9   :  { %v130_v18 = vadd.f32 %v127_v15, %v126_v13  ;;  %v117_v19 = vadd.f32 %v116_v14, %v111_v11 }
  0xab   :  { %v118_v20 = vadd.f32 %v117_v19, %v113_v16  ;;  %v131_v22 = vadd.f32 %v130_v18, %v128_v17 }
  0xad   :  { %v119_v23 = vrot.slane %v118_v20, 4  ;;  %v132_v24 = vadd.f32 %v131_v22, %v129_v21 }
  0xaf   :  { %v120_v25 = vadd.f32 %v119_v23, %v118_v20  ;;  %v133_v26 = vrot.slane %v132_v24, 4 }
  0xb1   :  { %v121_v27 = vrot.slane %v120_v25, 2  ;;  %v134_v28 = vadd.f32 %v133_v26, %v132_v24 }
  0xb3   :  { %v122_v29 = vadd.f32 %v121_v27, %v120_v25  ;;  %v135_v30 = vrot.slane %v134_v28, 2 }
  0xb5   :  { %v123_v31 = vrot.slane %v122_v29, 1  ;;  %v136_v32 = vadd.f32 %v135_v30, %v134_v28 }
  0xb7   :  { %v124_v33 = vadd.f32 %v123_v31, %v122_v29  ;;  %v137_v34 = vrot.slane %v136_v32, 1 }
  0xb9   :  { %v125_v35 = vmul.f32 0.03125, %v124_v33  ;;  %v138_v36 = vadd.f32 %v137_v34, %v136_v32 }
  0xbb   :  { %v139_v37 = vmul.f32 0.03125, %v138_v36  ;;  %v140_v38 = vmul.f32 %v125_v35, %v125_v35  ;;  %v155_v50 = vsub.f32 %v106_v10, %v125_v35  ;;  %v156_v51 = vsub.f32 %v108_v12, %v125_v35 }
  0xbc   :  { %v157_v52 = vsub.f32 %v111_v11, %v125_v35  ;;  %v158_v53 = vsub.f32 %v113_v16, %v125_v35 }
  0xbd   :  { %v141_v39 = vsub.f32 %v139_v37, %v140_v38 }
  0xbf   :  { %v143_v40 = vadd.f32 1e-05, %v141_v39 }
  0xc1   :  { %268 = vrsqrt.f32 %v143_v40  ;;  %vm150_vm1 = vweird.f32 %v143_v40 }
  0xc7   :  { %v269_v41 = vpop.eup %268 }
  0xc8   :  { %v145_v42 = vmul.f32 %v269_v41, %v143_v40  ;;  %vm151_vm0 = vweird.f32 %v269_v41 }
  0xc9   :  { %vm152_vm2 = vmor %vm150_vm1, %vm151_vm0 }
  0xca   :  { %v146_v43 = vmul.f32 %v269_v41, %v145_v42 }
  0xcc   :  { %v147_v44 = vmul.f32 0.5, %v146_v43 }
  0xce   :  { %v148_v45 = vsub.f32 1.5, %v147_v44 }
  0xd0   :  { %v149_v47 = vmul.f32 %v269_v41, %v148_v45 }
  0xd2   :  { %v153_v48 = vsel %vm152_vm2, %v269_v41, %v149_v47 }
  0xd3   :  { %v154_v49 = vmul.f32 %v153_v48, %v142_v46 }
  0xd5   :  { %v160_v54 = vperm.slane %v154_v49, 0 }
  0xd7   :  { %v162_v56 = vmul.f32 %v160_v54, %v155_v50  ;;  %v163_v57 = vmul.f32 %v160_v54, %v156_v51  ;;  %v164_v58 = vmul.f32 %v160_v54, %v157_v52  ;;  %v165_v59 = vmul.f32 %v160_v54, %v158_v53 }
  0xd9   :  { %v170_v60 = vadd.f32 %v267_v55, %v162_v56  ;;  %v171_v61 = vadd.f32 %v267_v55, %v163_v57  ;;  %v172_v62 = vadd.f32 %v267_v55, %v164_v58  ;;  %v173_v63 = vadd.f32 %v267_v55, %v165_v59 }
  0xdb   :  { %vm174_vm3 = vcmp.ge.f32.partialorder %v170_v60, 0.0  ;;  %vm175_vm4 = vcmp.ge.f32.partialorder %v171_v61, 0.0  ;;  %vm176_vm5 = vcmp.ge.f32.partialorder %v172_v62, 0.0  ;;  %vm177_vm6 = vcmp.ge.f32.partialorder %v173_v63, 0.0 }
  0xdc   :  { %v178_v0 = vmul.f32 0.2, %v170_v60  ;;  %v179_v1 = vmul.f32 0.2, %v171_v61  ;;  %v180_v2 = vmul.f32 0.2, %v172_v62 }
  0xdd   :  { %v181_v3 = vmul.f32 0.2, %v173_v63 }
  0xde   :  { %v182_v4 = vsel %vm174_vm3, %v170_v60, %v178_v0  ;;  %v183_v5 = vsel %vm175_vm4, %v171_v61, %v179_v1  ;;  %v184_v6 = vsel %vm176_vm5, %v172_v62, %v180_v2 }
  0xdf   :  { %v185_v7 = vsel %vm177_vm6, %v173_v63, %v181_v3  ;;  %v251_v8 = vpack.c.bf16 %v183_v5, %v182_v4 }
  0xe0   :  { %v256_v9 = vpack.c.bf16 %v185_v7, %v184_v6 }
  0xe1   :  { %252 = vst [vmem:[%s341_s4] sm:$0xff] %v251_v8  }
  0xe2   :  { %258 = vst [vmem:[%s341_s4 + $0x8] sm:$0xff] %v256_v9  }

// kernel: discriminator_forward.8
= control target key start
LH: loop header
LB: loop body
LE: loop exit
PB: predicated region body
PF: predicated region fallthrough
CT: control target
= control target key end

     0   :  { %s528_s1 = inlined_call_operand.vmem [shape: bf16[256,128], index: 1, kind: input, shape index: {}]   ;;  %s529_s0 = inlined_call_operand.vmem [shape: bf16[32,256], index: 0, kind: input, shape index: {}]   ;;  %s530_s3 = inlined_call_operand.vmem [shape: f32[1,128], index: 3, kind: input, shape index: {}]   ;;  %s531_s2 = inlined_call_operand.vmem [shape: f32[1,128], index: 2, kind: input, shape index: {}]   ;;  %s532_s4 = inlined_call_operand.vmem [shape: bf16[32,128], index: 4, kind: output, shape index: {}]  }
   0x1   :  { %v380_v0 = vld [vmem:[%s528_s1 + $0x38] sm:$0xff]  ;;  %v379_v2 = vld [vmem:[%s528_s1 + $0x30] sm:$0xff]  ;;  %v378_v4 = vld [vmem:[%s528_s1 + $0x28] sm:$0xff] }
   0x2   :  { %v388_v1 = vld [vmem:[%s528_s1 + $0x78] sm:$0xff]  ;;  %169 = vmatpush.bf16.msra.mxu0 %v380_v0  ;;  %400 = vmatpush.bf16.msra.mxu2 %v380_v0  ;;  %v387_v3 = vld [vmem:[%s528_s1 + $0x70] sm:$0xff]  ;;  %v386_v5 = vld [vmem:[%s528_s1 + $0x68] sm:$0xff] }
   0x3   :  { %188 = vmatpush.bf16.msra.mxu1 %v388_v1  ;;  %408 = vmatpush.bf16.msra.mxu3 %v388_v1  ;;  %v377_v6 = vld [vmem:[%s528_s1 + $0x20] sm:$0xff]  ;;  %v376_v8 = vld [vmem:[%s528_s1 + $0x18] sm:$0xff]  ;;  %v375_v10 = vld [vmem:[%s528_s1 + $0x10] sm:$0xff] }
   0x4   :  { %v385_v7 = vld [vmem:[%s528_s1 + $0x60] sm:$0xff]  ;;  %v384_v9 = vld [vmem:[%s528_s1 + $0x58] sm:$0xff]  ;;  %v383_v11 = vld [vmem:[%s528_s1 + $0x50] sm:$0xff] }
   0x5   :  { %v374_v12 = vld [vmem:[%s528_s1 + $0x8] sm:$0xff]  ;;  %v373_v14 = vld [vmem:[%s528_s1] sm:$0xff]  ;;  %v299_v18 = vld [vmem:[%s529_s0 + $0x10] sm:$0xf] }
   0x6   :  { %170 = vmatpush.bf16.msra.mxu0 %v379_v2  ;;  %401 = vmatpush.bf16.msra.mxu2 %v379_v2  ;;  %v382_v13 = vld [vmem:[%s528_s1 + $0x48] sm:$0xff]  ;;  %v381_v15 = vld [vmem:[%s528_s1 + $0x40] sm:$0xff]  ;;  %v372_v19 = vld [vmem:[%s529_s0 + $0x14] sm:$0xf0] }
   0x7   :  { %189 = vmatpush.bf16.msra.mxu1 %v387_v3  ;;  %409 = vmatpush.bf16.msra.mxu3 %v387_v3  ;;  %v291_v16 = vld [vmem:[%s529_s0] sm:$0xf]  ;;  %v370_v17 = vld [vmem:[%s529_s0 + $0x4] sm:$0xf0]  ;;  %v369_v20 = vld [vmem:[%s529_s0 + $0x4] sm:$0xf]  ;;  %v300_v25 = vor.u32 %v372_v19, %v299_v18 }
   0x8   :  { %v293_v21 = vld [vmem:[%s529_s0 + $0x8] sm:$0xf0]  ;;  %v371_v22 = vld [vmem:[%s529_s0 + $0x14] sm:$0xf]  ;;  %v301_v23 = vld [vmem:[%s529_s0 + $0x18] sm:$0xf0]  ;;  %v292_v24 = vor.u32 %v370_v17, %v291_v16 }
   0x9   :  { %v296_v26 = vor.u32 %v369_v20, %v293_v21  ;;  %v304_v27 = vor.u32 %v371_v22, %v301_v23  ;;  %v416_v17 = vld [vmem:[%s530_s3] ss:$0 sm:$0xff] }
   0xa   :  { %171 = vmatpush.bf16.msra.mxu0 %v378_v4  ;;  %402 = vmatpush.bf16.msra.mxu2 %v378_v4 }
   0xb   :  { %190 = vmatpush.bf16.msra.mxu1 %v386_v5  ;;  %410 = vmatpush.bf16.msra.mxu3 %v386_v5 }
   0xe   :  { %172 = vmatpush.bf16.msra.mxu0 %v377_v6  ;;  %403 = vmatpush.bf16.msra.mxu2 %v377_v6 }
   0xf   :  { %191 = vmatpush.bf16.msra.mxu1 %v385_v7  ;;  %411 = vmatpush.bf16.msra.mxu3 %v385_v7 }
  0x12   :  { %173 = vmatpush.bf16.msra.mxu0 %v376_v8  ;;  %404 = vmatpush.bf16.msra.mxu2 %v376_v8  ;;  %v233_v8 = vld [vmem:[%s531_s2] sm:$0x1] }
  0x13   :  { %192 = vmatpush.bf16.msra.mxu1 %v384_v9  ;;  %412 = vmatpush.bf16.msra.mxu3 %v384_v9 }
  0x16   :  { %174 = vmatpush.bf16.msra.mxu0 %v375_v10  ;;  %405 = vmatpush.bf16.msra.mxu2 %v375_v10 }
  0x17   :  { %193 = vmatpush.bf16.msra.mxu1 %v383_v11  ;;  %413 = vmatpush.bf16.msra.mxu3 %v383_v11 }
  0x1a   :  { %175 = vmatpush.bf16.msra.mxu0 %v374_v12  ;;  %406 = vmatpush.bf16.msra.mxu2 %v374_v12 }
  0x1b   :  { %194 = vmatpush.bf16.msra.mxu1 %v382_v13  ;;  %414 = vmatpush.bf16.msra.mxu3 %v382_v13 }
  0x1e   :  { %176 = vmatpush.bf16.msra.mxu0 %v373_v14  ;;  %407 = vmatpush.bf16.msra.mxu2 %v373_v14 }
  0x1f   :  { %195 = vmatpush.bf16.msra.mxu1 %v381_v15  ;;  %415 = vmatpush.bf16.msra.mxu3 %v381_v15 }
  0x21   :  { %177 = vmatmul.bf16.vlgmr.msra.gmra.mxu0 %v292_v24  ;;  %182 = vmatmul.bf16.vlgmr.msra.gmra.mxu2 %v300_v25 }
  0x22   :  { %196 = vmatmul.bf16.vlgmr.msra.gmra.mxu1 %v296_v26  ;;  %201 = vmatmul.bf16.vlgmr.msra.gmra.mxu3 %v304_v27 }
  0x9e   :  { %v178_v28 = vpop.f32.mrf.mxu0 }
  0x9f   :  { %v197_v29 = vpop.f32.mrf.mxu1 }
  0xa0   :  { %v198_v32 = vadd.f32 %v197_v29, %v178_v28 }
  0xa2   :  { %v217_v36 = vmul.f32 %v198_v32, %v198_v32 }
  0xa4   :  { %v183_v30 = vpop.f32.mrf.mxu2 }
  0xa5   :  { %v202_v31 = vpop.f32.mrf.mxu3 }
  0xa6   :  { %v180_v33 = vpop.f32.mrf.mxu0  ;;  %v203_v37 = vadd.f32 %v202_v31, %v183_v30 }
  0xa7   :  { %v199_v34 = vpop.f32.mrf.mxu1 }
  0xa8   :  { %v200_v35 = vadd.f32 %v199_v34, %v180_v33  ;;  %v219_v43 = vmul.f32 %v203_v37, %v203_v37 }
  0xaa   :  { %v207_v38 = vadd.f32 %v200_v35, %v198_v32  ;;  %v218_v39 = vmul.f32 %v200_v35, %v200_v35 }
  0xac   :  { %v221_v40 = vadd.f32 %v218_v39, %v217_v36  ;;  %v185_v41 = vpop.f32.mrf.mxu2  ;;  %v208_v45 = vadd.f32 %v207_v38, %v203_v37 }
  0xad   :  { %v204_v42 = vpop.f32.mrf.mxu3 }
  0xae   :  { %v205_v44 = vadd.f32 %v204_v42, %v185_v41  ;;  %v222_v48 = vadd.f32 %v221_v40, %v219_v43 }
  0xb0   :  { %v209_v46 = vadd.f32 %v208_v45, %v205_v44  ;;  %v220_v47 = vmul.f32 %v205_v44, %v205_v44 }
  0xb2   :  { %v210_v49 = vrot.slane %v209_v46, 4  ;;  %v223_v50 = vadd.f32 %v222_v48, %v220_v47 }
  0xb4   :  { %v211_v51 = vadd.f32 %v210_v49, %v209_v46  ;;  %v224_v52 = vrot.slane %v223_v50, 4 }
  0xb6   :  { %v212_v53 = vrot.slane %v211_v51, 2  ;;  %v225_v54 = vadd.f32 %v224_v52, %v223_v50 }
  0xb8   :  { %v213_v55 = vadd.f32 %v212_v53, %v211_v51  ;;  %v226_v56 = vrot.slane %v225_v54, 2 }
  0xba   :  { %v214_v57 = vrot.slane %v213_v55, 1  ;;  %v227_v58 = vadd.f32 %v226_v56, %v225_v54 }
  0xbc   :  { %v215_v59 = vadd.f32 %v214_v57, %v213_v55  ;;  %v228_v60 = vrot.slane %v227_v58, 1 }
  0xbe   :  { %v216_v61 = vmul.f32 0.055555556, %v215_v59  ;;  %v229_v62 = vadd.f32 %v228_v60, %v227_v58 }
  0xc0   :  { %v230_v63 = vmul.f32 0.055555556, %v229_v62  ;;  %v231_v0 = vmul.f32 %v216_v61, %v216_v61  ;;  %v246_v12 = vsub.f32 %v198_v32, %v216_v61  ;;  %v247_v13 = vsub.f32 %v200_v35, %v216_v61 }
  0xc1   :  { %v248_v14 = vsub.f32 %v203_v37, %v216_v61  ;;  %v249_v15 = vsub.f32 %v205_v44, %v216_v61 }
  0xc2   :  { %v232_v1 = vsub.f32 %v230_v63, %v231_v0 }
  0xc4   :  { %v234_v2 = vadd.f32 1e-05, %v232_v1 }
  0xc6   :  { %417 = vrsqrt.f32 %v234_v2  ;;  %vm241_vm1 = vweird.f32 %v234_v2 }
  0xcc   :  { %v418_v3 = vpop.eup %417 }
  0xcd   :  { %v236_v4 = vmul.f32 %v418_v3, %v234_v2  ;;  %vm242_vm0 = vweird.f32 %v418_v3 }
  0xce   :  { %vm243_vm2 = vmor %vm241_vm1, %vm242_vm0 }
  0xcf   :  { %v237_v5 = vmul.f32 %v418_v3, %v236_v4 }
  0xd1   :  { %v238_v6 = vmul.f32 0.5, %v237_v5 }
  0xd3   :  { %v239_v7 = vsub.f32 1.5, %v238_v6 }
  0xd5   :  { %v240_v9 = vmul.f32 %v418_v3, %v239_v7 }
  0xd7   :  { %v244_v10 = vsel %vm243_vm2, %v418_v3, %v240_v9 }
  0xd8   :  { %v245_v11 = vmul.f32 %v244_v10, %v233_v8 }
  0xda   :  { %v251_v16 = vperm.slane %v245_v11, 0 }
  0xdc   :  { %v253_v18 = vmul.f32 %v251_v16, %v246_v12  ;;  %v254_v19 = vmul.f32 %v251_v16, %v247_v13  ;;  %v255_v20 = vmul.f32 %v251_v16, %v248_v14  ;;  %v256_v21 = vmul.f32 %v251_v16, %v249_v15 }
  0xde   :  { %v261_v22 = vadd.f32 %v416_v17, %v253_v18  ;;  %v262_v23 = vadd.f32 %v416_v17, %v254_v19  ;;  %v263_v24 = vadd.f32 %v416_v17, %v255_v20  ;;  %v264_v25 = vadd.f32 %v416_v17, %v256_v21 }
  0xe0   :  { %vm265_vm3 = vcmp.ge.f32.partialorder %v261_v22, 0.0  ;;  %vm266_vm4 = vcmp.ge.f32.partialorder %v262_v23, 0.0  ;;  %vm267_vm5 = vcmp.ge.f32.partialorder %v263_v24, 0.0  ;;  %vm268_vm6 = vcmp.ge.f32.partialorder %v264_v25, 0.0 }
  0xe1   :  { %v269_v26 = vmul.f32 0.2, %v261_v22  ;;  %v270_v27 = vmul.f32 0.2, %v262_v23  ;;  %v271_v28 = vmul.f32 0.2, %v263_v24 }
  0xe2   :  { %v272_v29 = vmul.f32 0.2, %v264_v25 }
  0xe3   :  { %v273_v30 = vsel %vm265_vm3, %v261_v22, %v269_v26  ;;  %v274_v31 = vsel %vm266_vm4, %v262_v23, %v270_v27  ;;  %v275_v32 = vsel %vm267_vm5, %v263_v24, %v271_v28 }
  0xe4   :  { %v276_v33 = vsel %vm268_vm6, %v264_v25, %v272_v29  ;;  %v392_v34 = vpack.c.bf16 %v274_v31, %v273_v30 }
  0xe5   :  { %v397_v35 = vpack.c.bf16 %v276_v33, %v275_v32 }
  0xe6   :  { %393 = vst [vmem:[%s532_s4] sm:$0xff] %v392_v34  }
  0xe7   :  { %399 = vst [vmem:[%s532_s4 + $0x8] sm:$0xff] %v397_v35  }

// kernel: discriminator_forward.9
= control target key start
LH: loop header
LB: loop body
LE: loop exit
PB: predicated region body
PF: predicated region fallthrough
CT: control target
= control target key end

     0   :  { %s736_s1 = inlined_call_operand.vmem [shape: bf16[512,128], index: 1, kind: input, shape index: {}]   ;;  %s737_s2 = inlined_call_operand.vmem [shape: f32[1,128], index: 2, kind: input, shape index: {}]   ;;  %s738_s0 = inlined_call_operand.vmem [shape: bf16[16,512], index: 0, kind: input, shape index: {}]   ;;  %s739_s3 = inlined_call_operand.vmem [shape: f32[16,128], index: 3, kind: output, shape index: {}]  }
   0x1   :  { %v553_v0 = vld [vmem:[%s736_s1 + $0x38] sm:$0xff]  ;;  %v552_v4 = vld [vmem:[%s736_s1 + $0x30] sm:$0xff]  ;;  %v551_v8 = vld [vmem:[%s736_s1 + $0x28] sm:$0xff] }
   0x2   :  { %v561_v1 = vld [vmem:[%s736_s1 + $0x78] sm:$0xff]  ;;  %298 = vmatpush.bf16.msra.mxu0 %v553_v0  ;;  %v560_v5 = vld [vmem:[%s736_s1 + $0x70] sm:$0xff]  ;;  %v559_v9 = vld [vmem:[%s736_s1 + $0x68] sm:$0xff] }
   0x3   :  { %v569_v2 = vld [vmem:[%s736_s1 + $0xb8] sm:$0xff]  ;;  %312 = vmatpush.bf16.msra.mxu1 %v561_v1  ;;  %v568_v6 = vld [vmem:[%s736_s1 + $0xb0] sm:$0xff]  ;;  %v567_v10 = vld [vmem:[%s736_s1 + $0xa8] sm:$0xff] }
   0x4   :  { %v577_v3 = vld [vmem:[%s736_s1 + $0xf8] sm:$0xff]  ;;  %326 = vmatpush.bf16.msra.mxu2 %v569_v2  ;;  %v576_v7 = vld [vmem:[%s736_s1 + $0xf0] sm:$0xff]  ;;  %v575_v11 = vld [vmem:[%s736_s1 + $0xe8] sm:$0xff] }
   0x5   :  { %340 = vmatpush.bf16.msra.mxu3 %v577_v3  ;;  %v550_v12 = vld [vmem:[%s736_s1 + $0x20] sm:$0xff]  ;;  %v549_v16 = vld [vmem:[%s736_s1 + $0x18] sm:$0xff]  ;;  %v548_v20 = vld [vmem:[%s736_s1 + $0x10] sm:$0xff] }
   0x6   :  { %299 = vmatpush.bf16.msra.mxu0 %v552_v4  ;;  %v558_v13 = vld [vmem:[%s736_s1 + $0x60] sm:$0xff]  ;;  %v557_v17 = vld [vmem:[%s736_s1 + $0x58] sm:$0xff]  ;;  %v556_v21 = vld [vmem:[%s736_s1 + $0x50] sm:$0xff] }
   0x7   :  { %313 = vmatpush.bf16.msra.mxu1 %v560_v5  ;;  %v566_v14 = vld [vmem:[%s736_s1 + $0xa0] sm:$0xff]  ;;  %v565_v18 = vld [vmem:[%s736_s1 + $0x98] sm:$0xff]  ;;  %v564_v22 = vld [vmem:[%s736_s1 + $0x90] sm:$0xff] }
   0x8   :  { %327 = vmatpush.bf16.msra.mxu2 %v568_v6  ;;  %v574_v15 = vld [vmem:[%s736_s1 + $0xe0] sm:$0xff]  ;;  %v573_v19 = vld [vmem:[%s736_s1 + $0xd8] sm:$0xff]  ;;  %v572_v23 = vld [vmem:[%s736_s1 + $0xd0] sm:$0xff] }
   0x9   :  { %341 = vmatpush.bf16.msra.mxu3 %v576_v7  ;;  %v547_v24 = vld [vmem:[%s736_s1 + $0x8] sm:$0xff]  ;;  %v546_v28 = vld [vmem:[%s736_s1] sm:$0xff]  ;;  %v544_v33 = vld [vmem:[%s738_s0 + $0xc] sm:$0xf0] }
   0xa   :  { %300 = vmatpush.bf16.msra.mxu0 %v551_v8  ;;  %v555_v25 = vld [vmem:[%s736_s1 + $0x48] sm:$0xff]  ;;  %v554_v29 = vld [vmem:[%s736_s1 + $0x40] sm:$0xff]  ;;  %v402_v35 = vld [vmem:[%s738_s0 + $0x10] sm:$0xf0] }
   0xb   :  { %314 = vmatpush.bf16.msra.mxu1 %v559_v9  ;;  %v563_v26 = vld [vmem:[%s736_s1 + $0x88] sm:$0xff]  ;;  %v562_v30 = vld [vmem:[%s736_s1 + $0x80] sm:$0xff]  ;;  %v545_v37 = vld [vmem:[%s738_s0 + $0x14] sm:$0xf0] }
   0xc   :  { %328 = vmatpush.bf16.msra.mxu2 %v567_v10  ;;  %v571_v27 = vld [vmem:[%s736_s1 + $0xc8] sm:$0xff]  ;;  %v570_v31 = vld [vmem:[%s736_s1 + $0xc0] sm:$0xff]  ;;  %v410_v39 = vld [vmem:[%s738_s0 + $0x18] sm:$0xf0] }
   0xd   :  { %342 = vmatpush.bf16.msra.mxu3 %v575_v11  ;;  %v400_v32 = vld [vmem:[%s738_s0] sm:$0xf]  ;;  %v542_v34 = vld [vmem:[%s738_s0 + $0x4] sm:$0xf]  ;;  %v408_v36 = vld [vmem:[%s738_s0 + $0x8] sm:$0xf] }
   0xe   :  { %301 = vmatpush.bf16.msra.mxu0 %v550_v12  ;;  %v543_v38 = vld [vmem:[%s738_s0 + $0xc] sm:$0xf]  ;;  %v401_v40 = vor.u32 %v544_v33, %v400_v32  ;;  %v405_v41 = vor.u32 %v542_v34, %v402_v35  ;;  %v409_v42 = vor.u32 %v545_v37, %v408_v36  ;;  %v578_v44 = vld [vmem:[%s737_s2] ss:$0 sm:$0xff] }
   0xf   :  { %315 = vmatpush.bf16.msra.mxu1 %v558_v13  ;;  %v413_v43 = vor.u32 %v543_v38, %v410_v39 }
  0x10   :  { %329 = vmatpush.bf16.msra.mxu2 %v566_v14 }
  0x11   :  { %343 = vmatpush.bf16.msra.mxu3 %v574_v15 }
  0x12   :  { %302 = vmatpush.bf16.msra.mxu0 %v549_v16 }
  0x13   :  { %316 = vmatpush.bf16.msra.mxu1 %v557_v17 }
  0x14   :  { %330 = vmatpush.bf16.msra.mxu2 %v565_v18 }
  0x15   :  { %344 = vmatpush.bf16.msra.mxu3 %v573_v19 }
  0x16   :  { %303 = vmatpush.bf16.msra.mxu0 %v548_v20 }
  0x17   :  { %317 = vmatpush.bf16.msra.mxu1 %v556_v21 }
  0x18   :  { %331 = vmatpush.bf16.msra.mxu2 %v564_v22 }
  0x19   :  { %345 = vmatpush.bf16.msra.mxu3 %v572_v23 }
  0x1a   :  { %304 = vmatpush.bf16.msra.mxu0 %v547_v24 }
  0x1b   :  { %318 = vmatpush.bf16.msra.mxu1 %v555_v25 }
  0x1c   :  { %332 = vmatpush.bf16.msra.mxu2 %v563_v26 }
  0x1d   :  { %346 = vmatpush.bf16.msra.mxu3 %v571_v27 }
  0x1e   :  { %305 = vmatpush.bf16.msra.mxu0 %v546_v28 }
  0x1f   :  { %319 = vmatpush.bf16.msra.mxu1 %v554_v29 }
  0x20   :  { %333 = vmatpush.bf16.msra.mxu2 %v562_v30 }
  0x21   :  { %347 = vmatpush.bf16.msra.mxu3 %v570_v31  ;;  %306 = vmatmul.bf16.vlgmr.msra.gmra.mxu0 %v401_v40 }
  0x22   :  { %320 = vmatmul.bf16.vlgmr.msra.gmra.mxu1 %v405_v41 }
  0x23   :  { %334 = vmatmul.bf16.vlgmr.msra.gmra.mxu2 %v409_v42 }
  0x24   :  { %348 = vmatmul.bf16.vlgmr.msra.gmra.mxu3 %v413_v43 }
  0x9e   :  { %v307_v45 = vpop.f32.mrf.mxu0 }
  0x9f   :  { %v308_v46 = vadd.f32 %v578_v44, %v307_v45  ;;  %v321_v47 = vpop.f32.mrf.mxu1 }
  0xa1   :  { %v322_v48 = vadd.f32 %v321_v47, %v308_v46 }
  0xa6   :  { %v335_v49 = vpop.f32.mrf.mxu2  ;;  %v309_v52 = vpop.f32.mrf.mxu0 }
  0xa7   :  { %v349_v50 = vpop.f32.mrf.mxu3  ;;  %v336_v51 = vadd.f32 %v335_v49, %v322_v48  ;;  %v310_v54 = vadd.f32 %v578_v44, %v309_v52  ;;  %v323_v56 = vpop.f32.mrf.mxu1 }
  0xa9   :  { %v350_v53 = vadd.f32 %v349_v50, %v336_v51  ;;  %v324_v58 = vadd.f32 %v323_v56, %v310_v54 }
  0xab   :  { %v354_v55 = vsub.f32 0.0, %v350_v53 }
  0xad   :  { %v356_v57 = vmul.f32 1.442695, %v354_v55 }
  0xae   :  { %v337_v59 = vpop.f32.mrf.mxu2 }
  0xaf   :  { %579 = vpow2.f32 %v356_v57  ;;  %v338_v60 = vadd.f32 %v337_v59, %v324_v58  ;;  %v351_v61 = vpop.f32.mrf.mxu3 }
  0xb1   :  { %v352_v62 = vadd.f32 %v351_v61, %v338_v60 }
  0xb3   :  { %v355_v63 = vsub.f32 0.0, %v352_v62 }
  0xb5   :  { %v580_v0 = vpop.eup %579  ;;  %v358_v1 = vmul.f32 1.442695, %v355_v63 }
  0xb6   :  { %v360_v2 = vadd.f32 1.0, %v580_v0 }
  0xb7   :  { %581 = vpow2.f32 %v358_v1 }
  0xb8   :  { %583 = vrcp.f32 %v360_v2  ;;  %v373_v8 = vand.u32 2147483648, %v360_v2  ;;  %v371_v10 = vand.u32 2147483647, %v360_v2  ;;  %vm367_vm1 = vweird.f32 %v360_v2 }
  0xba   :  { %v374_v13 = vor.u32 1.1754944e-38, %v373_v8  ;;  %vm372_vm3 = vcmp.eq.f32.partialorder %v371_v10, 8.507059e+37 }
  0xbd   :  { %v582_v3 = vpop.eup %581 }
  0xbe   :  { %v584_v4 = vpop.eup %583  ;;  %v361_v5 = vadd.f32 1.0, %v582_v3 }
  0xbf   :  { %v363_v6 = vmul.f32 %v584_v4, %v360_v2  ;;  %vm368_vm0 = vweird.f32 %v584_v4 }
  0xc0   :  { %585 = vrcp.f32 %v361_v5  ;;  %vm369_vm2 = vmor %vm367_vm1, %vm368_vm0  ;;  %v388_v18 = vand.u32 2147483648, %v361_v5  ;;  %v386_v20 = vand.u32 2147483647, %v361_v5  ;;  %vm382_vm5 = vweird.f32 %v361_v5 }
  0xc1   :  { %v364_v7 = vsub.f32 1.0, %v363_v6 }
  0xc2   :  { %v389_v22 = vor.u32 1.1754944e-38, %v388_v18  ;;  %vm387_vm7 = vcmp.eq.f32.partialorder %v386_v20, 8.507059e+37 }
  0xc3   :  { %v365_v9 = vmul.f32 %v584_v4, %v364_v7 }
  0xc5   :  { %v366_v11 = vadd.f32 %v584_v4, %v365_v9 }
  0xc6   :  { %v586_v12 = vpop.eup %585 }
  0xc7   :  { %v370_v14 = vsel %vm369_vm2, %v584_v4, %v366_v11  ;;  %v378_v15 = vmul.f32 %v586_v12, %v361_v5  ;;  %vm383_vm4 = vweird.f32 %v586_v12 }
  0xc8   :  { %v375_v16 = vsel %vm372_vm3, %v374_v13, %v370_v14  ;;  %vm384_vm6 = vmor %vm382_vm5, %vm383_vm4 }
  0xc9   :  { %392 = vst [vmem:[%s739_s3] sm:$0xff] %v375_v16  ;;  %v379_v17 = vsub.f32 1.0, %v378_v15 }
  0xcb   :  { %v380_v19 = vmul.f32 %v586_v12, %v379_v17 }
  0xcd   :  { %v381_v21 = vadd.f32 %v586_v12, %v380_v19 }
  0xcf   :  { %v385_v23 = vsel %vm384_vm6, %v586_v12, %v381_v21 }
  0xd0   :  { %v390_v24 = vsel %vm387_vm7, %v389_v22, %v385_v23 }
  0xd1   :  { %393 = vst [vmem:[%s739_s3 + $0x8] sm:$0xff] %v390_v24 }

</bundles_post_ra>
